<compile_context>
chip_gen: v7x
topology: tpu7x:2x2x1
jax: 0.10.0
libtpu: 0.0.40
codegen_flags: <defaults>
</compile_context>

<pallas_src>
import functools

import jax
import jax.numpy as jnp
from jax.experimental import pallas as pl
from jax.experimental.pallas import tpu as pltpu


def _prelu(x, a):
    return jnp.where(x > 0, x, a * x)


def _din_kernel(hist_ref, tgt_ref, len_ref,
                aw1_ref, aw2_ref, fw1_ref, fw2_ref,
                rows_ref, scal_ref, out_ref, *, cdt, dims, approx_recip):
    D, A1, A2, F1, F2 = dims
    h = hist_ref[...]            # (TB, T, D) f32, streamed once from HBM
    tgt = tgt_ref[...]           # (TB, D)   f32
    TB, T, _ = h.shape

    rows = rows_ref[...]         # (6, LROW) f32 lane-padded row vectors
    ab1 = rows[0, :A1]
    ab2 = rows[1, :A2]
    aw3 = rows[2, :A2]           # attention head (A2 -> 1) as a lane reduction
    fb1 = rows[3, :F1]
    fb2 = rows[4, :F2]
    fw3 = rows[5, :F2]           # final head (F2 -> 1) as a lane reduction
    ab3, fb3 = scal_ref[0], scal_ref[1]
    a0, a1, a2, a3 = scal_ref[2], scal_ref[3], scal_ref[4], scal_ref[5]

    # ---- local activation unit: lane-dense [h, t, h-t, h*t] concat, one K=4D matmul
    h2 = h.reshape(TB * T, D)
    t2 = jnp.broadcast_to(tgt[:, None, :], (TB, T, D)).reshape(TB * T, D)
    feat = jnp.concatenate([h2, t2, h2 - t2, h2 * t2], axis=-1).astype(cdt)  # (TB*T, 4D)
    x = jnp.dot(feat, aw1_ref[...], preferred_element_type=jnp.float32) + ab1
    x = _prelu(x, a0)
    x = jnp.dot(x.astype(cdt), aw2_ref[...], preferred_element_type=jnp.float32) + ab2
    x = _prelu(x, a1)                                                  # (TB*T, A2)
    scores = jnp.sum(x.reshape(TB, T, A2) * aw3, axis=-1) + ab3        # (TB, T)

    # ---- masked softmax over the behaviour sequence (T on the lane axis) ----
    t_idx = jax.lax.broadcasted_iota(jnp.int32, (TB, T), 1)
    valid = t_idx < len_ref[...]                                       # (TB, T)
    scores = jnp.where(valid, scores, -1e9)
    scores = scores - jnp.max(scores, axis=-1, keepdims=True)
    p = jnp.exp(scores)                                                # unnormalized
    l = jnp.sum(p, axis=-1, keepdims=True)                             # (TB, 1)

    # ---- weighted-sum pooling from f32 history; fold 1/l into the pooled vector ----
    interest = jnp.sum(p[:, :, None] * h, axis=1)                      # (TB, D)
    interest = interest * pl.reciprocal(l, approx=approx_recip)

    # ---- prediction MLP with PReLU ----
    z = jnp.concatenate([interest, tgt, interest * tgt], axis=-1).astype(cdt)
    z = _prelu(jnp.dot(z, fw1_ref[...], preferred_element_type=jnp.float32) + fb1, a2)
    z = _prelu(jnp.dot(z.astype(cdt), fw2_ref[...],
                       preferred_element_type=jnp.float32) + fb2, a3)
    logit = jnp.sum(z * fw3, axis=-1, keepdims=True) + fb3              # (TB, 1)
    out_ref[...] = logit.astype(out_ref.dtype)


def _pick_tile(batch, want):
    """Largest batch tile <= want that divides batch and is sublane-aligned."""
    want = max(1, min(want, batch))
    for t in range(want, 0, -1):
        if batch % t == 0 and (t % 8 == 0 or t == batch):
            return t
    return batch


def _resident_spec(shape):
    n = len(shape)
    return pl.BlockSpec(shape, lambda i, _n=n: (0,) * _n)


def din_forward(hist, target, lengths, params, *, tile_b=512,
                mxu_dtype=jnp.bfloat16):
    """hist: (B,T,D) f32, target: (B,D) f32, lengths: (B,) int valid-history lengths."""
    B, T, D = hist.shape
    (aw1, ab1, aw2, ab2, aw3, ab3, fw1, fb1, fw2, fb2, fw3, fb3, alphas) = params
    A1, A2 = aw1.shape[1], aw2.shape[1]
    F1, F2 = fw1.shape[1], fw2.shape[1]
    f32 = jnp.float32
    cdt = jnp.dtype(mxu_dtype)
    approx_recip = cdt != jnp.dtype(f32)

    # Batch tile divides B exactly (no wrapper pad/cast of hist); keep >= 2 tiles when
    # possible so "parallel" megacore sharding has work for both TensorCores.
    tile_b = _pick_tile(B, tile_b)
    n_tiles = B // tile_b

    # MXU weights cast once in the wrapper (tiny arrays; hist stays f32).
    aw1c, aw2c = aw1.astype(cdt), aw2.astype(cdt)
    fw1c, fw2c = fw1.astype(cdt), fw2.astype(cdt)

    # Pack the small f32 row vectors into a single lane-padded (6, LROW) ref.
    lrow = max(128, 128 * (-(-max(A1, A2, F1, F2) // 128)))

    def pad_row(v):
        v = v.reshape(-1).astype(f32)
        return jnp.pad(v, (0, lrow - v.shape[0]))

    rows = jnp.stack([pad_row(ab1), pad_row(ab2), pad_row(aw3),
                      pad_row(fb1), pad_row(fb2), pad_row(fw3)])        # (6, LROW)
    # Scalars packed into SMEM: [ab3, fb3, PReLU slopes a0..a3].
    scal = jnp.concatenate([ab3.reshape(-1), fb3.reshape(-1),
                            alphas.reshape(-1)]).astype(f32)            # (6,)

    lens2d = lengths.astype(jnp.int32).reshape(B, 1)

    weight_arrays = [aw1c, aw2c, fw1c, fw2c, rows]

    in_specs = [
        pl.BlockSpec((tile_b, T, D), lambda i: (i, 0, 0)),    # hist tile (f32, one HBM pass)
        pl.BlockSpec((tile_b, D), lambda i: (i, 0)),          # target tile
        pl.BlockSpec((tile_b, 1), lambda i: (i, 0)),          # lengths tile (int32)
    ] + [_resident_spec(a.shape) for a in weight_arrays] + [
        pl.BlockSpec(memory_space=pltpu.MemorySpace.SMEM),    # scalar biases + PReLU slopes
    ]

    kernel = functools.partial(_din_kernel, cdt=cdt, dims=(D, A1, A2, F1, F2),
                               approx_recip=approx_recip)
    out = pl.pallas_call(
        kernel,
        out_shape=jax.ShapeDtypeStruct((B, 1), f32),
        grid=(n_tiles,),
        in_specs=in_specs,
        out_specs=pl.BlockSpec((tile_b, 1), lambda i: (i, 0)),
        compiler_params=pltpu.CompilerParams(
            dimension_semantics=("parallel",),        # megacore-shard the batch
            # Headroom for large tiles on v5e/v6e; demo footprint is far smaller.
            vmem_limit_bytes=64 * 1024 * 1024),
    )(hist, target, lens2d, *weight_arrays, scal)
    return out


def init_params(key, D=32, A1=64, A2=32, F1=64, F2=32):
    """Deterministic PyTorch-style init: Linear ~ U(-1/sqrt(fan_in), +), PReLU a=0.25."""
    def linear(k, fan_in, fan_out):
        kw, kb = jax.random.split(k)
        bound = 1.0 / float(fan_in) ** 0.5
        w = jax.random.uniform(kw, (fan_in, fan_out), jnp.float32, -bound, bound)
        b = jax.random.uniform(kb, (1, fan_out), jnp.float32, -bound, bound)
        return w, b

    keys = jax.random.split(key, 6)
    aw1, ab1 = linear(keys[0], 4 * D, A1)
    aw2, ab2 = linear(keys[1], A1, A2)
    aw3c, ab3 = linear(keys[2], A2, 1)
    aw3 = aw3c.T                       # (1, A2) row vector used as a lane reduction
    fw1, fb1 = linear(keys[3], 3 * D, F1)
    fw2, fb2 = linear(keys[4], F1, F2)
    fw3, fb3 = linear(keys[5], F2, 1)
    alphas = jnp.full((4,), 0.25, jnp.float32)   # PReLU default slope
    return (aw1, ab1, aw2, ab2, aw3, ab3, fw1, fb1, fw2, fb2, fw3, fb3, alphas)


def din_reference(hist, target, lengths, params):
    """Pure-JAX reference mirroring the PyTorch (f32) semantics."""
    (aw1, ab1, aw2, ab2, aw3, ab3, fw1, fb1, fw2, fb2, fw3, fb3, alphas) = params
    B, T, D = hist.shape
    prelu = lambda x, a: jnp.where(x > 0, x, a * x)
    tgt_b = jnp.broadcast_to(target[:, None, :], (B, T, D))
    feat = jnp.concatenate([hist, tgt_b, hist - tgt_b, hist * tgt_b], axis=-1)
    x = feat.reshape(B * T, 4 * D)
    x = prelu(x @ aw1 + ab1, alphas[0])
    x = prelu(x @ aw2 + ab2, alphas[1])
    scores = (x @ aw3.T + ab3).reshape(B, T, 1)
    mask = (jnp.arange(T)[None, :] < lengths[:, None])[:, :, None]
    scores = jnp.where(mask, scores, -1e9)
    scores = scores - jnp.max(scores, axis=1, keepdims=True)
    p = jnp.exp(scores)
    p = p / jnp.sum(p, axis=1, keepdims=True)
    interest = jnp.sum(p * hist, axis=1)
    z = jnp.concatenate([interest, target, interest * target], axis=-1)
    z = prelu(z @ fw1 + fb1, alphas[2])
    z = prelu(z @ fw2 + fb2, alphas[3])
    return z @ fw3 + fb3


if __name__ == "__main__":
    key = jax.random.PRNGKey(0)
    k_hist, k_tgt, k_len, k_par = jax.random.split(key, 4)

    B, T, D = 16, 8, 32
    hist = jax.random.normal(k_hist, (B, T, D), jnp.float32)   # behaviour history embeddings
    target = jax.random.normal(k_tgt, (B, D), jnp.float32)     # target item embedding
    lengths = jax.random.randint(k_len, (B,), 1, T + 1)        # valid history lengths

    params = init_params(k_par, D=D)
    ref = din_reference(hist, target, lengths, params)

    # strict check: f32 MXU path, multi-tile grid (tile_b=8 -> 2 grid steps)
    out_f32 = din_forward(hist, target, lengths, params, tile_b=8,
                          mxu_dtype=jnp.float32)
    out_f32 = jax.block_until_ready(out_f32)
    assert out_f32.shape == (B, 1)
    assert bool(jnp.all(jnp.isfinite(out_f32)))
    assert jnp.allclose(out_f32, ref, rtol=1e-3, atol=1e-3), (out_f32, ref)

    # perf path: bf16 MXU operands + f32 accumulation, default tile (single grid step)
    out_bf16 = din_forward(hist, target, lengths, params, mxu_dtype=jnp.bfloat16)
    out_bf16 = jax.block_until_ready(out_bf16)
    assert out_bf16.shape == (B, 1)
    assert bool(jnp.all(jnp.isfinite(out_bf16)))
    assert jnp.allclose(out_bf16, ref, rtol=5e-2, atol=5e-2), (out_bf16, ref)

    print("KERNEL_OK")
</pallas_src>

<mosaic_0001>
module attributes {stable_mosaic.version = 11 : i64} {
  func.func @_din_kernel(%arg0: i32, %arg1: memref<8x8x32xf32, #tpu.memory_space<vmem>>, %arg2: memref<8x32xf32, #tpu.memory_space<vmem>>, %arg3: memref<8x1xi32, #tpu.memory_space<vmem>>, %arg4: memref<128x64xf32, #tpu.memory_space<vmem>>, %arg5: memref<64x32xf32, #tpu.memory_space<vmem>>, %arg6: memref<96x64xf32, #tpu.memory_space<vmem>>, %arg7: memref<64x32xf32, #tpu.memory_space<vmem>>, %arg8: memref<6x128xf32, #tpu.memory_space<vmem>>, %arg9: memref<6xf32, #tpu.memory_space<smem>>, %arg10: memref<8x1xf32, #tpu.memory_space<vmem>>) attributes {dimension_semantics = [#tpu.dimension_semantics<parallel>], iteration_bounds = array<i64: 2>, scalar_prefetch = 0 : i64, scratch_operands = 0 : i64, tpu.core_type = #tpu.core_type<tc>, window_params = [{transform_indices = @transform_0, window_bounds = array<i64: 8, 8, 32>}, {transform_indices = @transform_1, window_bounds = array<i64: 8, 32>}, {transform_indices = @transform_2, window_bounds = array<i64: 8, 1>}, {pipeline_mode = #tpu.pipeline_mode<synchronous>, transform_indices = @transform_3, window_bounds = array<i64: 128, 64>}, {pipeline_mode = #tpu.pipeline_mode<synchronous>, transform_indices = @transform_4, window_bounds = array<i64: 64, 32>}, {pipeline_mode = #tpu.pipeline_mode<synchronous>, transform_indices = @transform_5, window_bounds = array<i64: 96, 64>}, {pipeline_mode = #tpu.pipeline_mode<synchronous>, transform_indices = @transform_6, window_bounds = array<i64: 64, 32>}, {pipeline_mode = #tpu.pipeline_mode<synchronous>, transform_indices = @transform_7, window_bounds = array<i64: 6, 128>}, {transform_indices = @transform_8, window_bounds = array<i64: 6>}, {transform_indices = @transform_9, window_bounds = array<i64: 8, 1>}]} {
    %c0 = arith.constant 0 : index
    %c0_0 = arith.constant 0 : index
    %c0_1 = arith.constant 0 : index
    %0 = vector.load %arg1[%c0, %c0_0, %c0_1] : memref<8x8x32xf32, #tpu.memory_space<vmem>>, vector<8x8x32xf32>
    %c0_2 = arith.constant 0 : index
    %c0_3 = arith.constant 0 : index
    %1 = vector.load %arg2[%c0_2, %c0_3] : memref<8x32xf32, #tpu.memory_space<vmem>>, vector<8x32xf32>
    %c0_4 = arith.constant 0 : index
    %c0_5 = arith.constant 0 : index
    %2 = vector.load %arg8[%c0_4, %c0_5] : memref<6x128xf32, #tpu.memory_space<vmem>>, vector<6x128xf32>
    %3 = vector.extract_strided_slice %2 {offsets = [0, 0], sizes = [1, 64], strides = [1, 1]} : vector<6x128xf32> to vector<1x64xf32>
    %4 = vector.shape_cast %3 : vector<1x64xf32> to vector<64xf32>
    %5 = vector.extract_strided_slice %2 {offsets = [1, 0], sizes = [1, 32], strides = [1, 1]} : vector<6x128xf32> to vector<1x32xf32>
    %6 = vector.shape_cast %5 : vector<1x32xf32> to vector<32xf32>
    %7 = vector.extract_strided_slice %2 {offsets = [2, 0], sizes = [1, 32], strides = [1, 1]} : vector<6x128xf32> to vector<1x32xf32>
    %8 = vector.shape_cast %7 : vector<1x32xf32> to vector<32xf32>
    %9 = vector.extract_strided_slice %2 {offsets = [3, 0], sizes = [1, 64], strides = [1, 1]} : vector<6x128xf32> to vector<1x64xf32>
    %10 = vector.shape_cast %9 : vector<1x64xf32> to vector<64xf32>
    %11 = vector.extract_strided_slice %2 {offsets = [4, 0], sizes = [1, 32], strides = [1, 1]} : vector<6x128xf32> to vector<1x32xf32>
    %12 = vector.shape_cast %11 : vector<1x32xf32> to vector<32xf32>
    %13 = vector.extract_strided_slice %2 {offsets = [5, 0], sizes = [1, 32], strides = [1, 1]} : vector<6x128xf32> to vector<1x32xf32>
    %14 = vector.shape_cast %13 : vector<1x32xf32> to vector<32xf32>
    %c0_6 = arith.constant 0 : index
    %15 = memref.load %arg9[%c0_6] : memref<6xf32, #tpu.memory_space<smem>>
    %c1 = arith.constant 1 : index
    %16 = memref.load %arg9[%c1] : memref<6xf32, #tpu.memory_space<smem>>
    %c2 = arith.constant 2 : index
    %17 = memref.load %arg9[%c2] : memref<6xf32, #tpu.memory_space<smem>>
    %c3 = arith.constant 3 : index
    %18 = memref.load %arg9[%c3] : memref<6xf32, #tpu.memory_space<smem>>
    %c4 = arith.constant 4 : index
    %19 = memref.load %arg9[%c4] : memref<6xf32, #tpu.memory_space<smem>>
    %c5 = arith.constant 5 : index
    %20 = memref.load %arg9[%c5] : memref<6xf32, #tpu.memory_space<smem>>
    %21 = vector.shape_cast %0 : vector<8x8x32xf32> to vector<64x32xf32>
    %22 = vector.shape_cast %1 : vector<8x32xf32> to vector<8x1x32xf32>
    %23 = vector.shape_cast %22 : vector<8x1x32xf32> to vector<8x1x32xf32>
    %24 = vector.broadcast %23 : vector<8x1x32xf32> to vector<8x8x32xf32>
    %25 = vector.shape_cast %24 : vector<8x8x32xf32> to vector<64x32xf32>
    %26 = arith.subf %21, %25 : vector<64x32xf32>
    %27 = arith.mulf %21, %25 : vector<64x32xf32>
    %28 = tpu.concatenate %21, %25, %26, %27 in 1 : vector<64x32xf32>, vector<64x32xf32>, vector<64x32xf32>, vector<64x32xf32> -> vector<64x128xf32>
    %c0_7 = arith.constant 0 : index
    %c0_8 = arith.constant 0 : index
    %29 = vector.load %arg4[%c0_7, %c0_8] : memref<128x64xf32, #tpu.memory_space<vmem>>, vector<128x64xf32>
    %cst = arith.constant dense<0.000000e+00> : vector<64x64xf32>
    %30 = tpu.matmul %28, %29, %cst {dimension_numbers = #tpu.dot_dimension_numbers<[1], [0], [0], [1], [0, 0, 1, 1], [], []>} : vector<64x128xf32>, vector<128x64xf32>, vector<64x64xf32> -> vector<64x64xf32>
    %31 = vector.shape_cast %4 : vector<64xf32> to vector<1x64xf32>
    %32 = vector.broadcast %31 : vector<1x64xf32> to vector<64x64xf32>
    %33 = arith.addf %30, %32 : vector<64x64xf32>
    %cst_9 = arith.constant 0.000000e+00 : f32
    %34 = vector.broadcast %cst_9 : f32 to vector<64x64xf32>
    %35 = arith.cmpf ogt, %33, %34 : vector<64x64xf32>
    %36 = vector.broadcast %17 : f32 to vector<64x64xf32>
    %37 = arith.mulf %36, %33 : vector<64x64xf32>
    %38 = arith.select %35, %33, %37 : vector<64x64xi1>, vector<64x64xf32>
    %c0_10 = arith.constant 0 : index
    %c0_11 = arith.constant 0 : index
    %39 = vector.load %arg5[%c0_10, %c0_11] : memref<64x32xf32, #tpu.memory_space<vmem>>, vector<64x32xf32>
    %cst_12 = arith.constant dense<0.000000e+00> : vector<64x32xf32>
    %40 = tpu.matmul %38, %39, %cst_12 {dimension_numbers = #tpu.dot_dimension_numbers<[1], [0], [0], [1], [0, 0, 1, 1], [], []>} : vector<64x64xf32>, vector<64x32xf32>, vector<64x32xf32> -> vector<64x32xf32>
    %41 = vector.shape_cast %6 : vector<32xf32> to vector<1x32xf32>
    %42 = vector.broadcast %41 : vector<1x32xf32> to vector<64x32xf32>
    %43 = arith.addf %40, %42 : vector<64x32xf32>
    %cst_13 = arith.constant 0.000000e+00 : f32
    %44 = vector.broadcast %cst_13 : f32 to vector<64x32xf32>
    %45 = arith.cmpf ogt, %43, %44 : vector<64x32xf32>
    %46 = vector.broadcast %18 : f32 to vector<64x32xf32>
    %47 = arith.mulf %46, %43 : vector<64x32xf32>
    %48 = arith.select %45, %43, %47 : vector<64x32xi1>, vector<64x32xf32>
    %49 = vector.shape_cast %48 : vector<64x32xf32> to vector<8x8x32xf32>
    %50 = vector.shape_cast %8 : vector<32xf32> to vector<1x1x32xf32>
    %51 = vector.broadcast %50 : vector<1x1x32xf32> to vector<8x8x32xf32>
    %52 = arith.mulf %49, %51 : vector<8x8x32xf32>
    %cst_14 = arith.constant dense<0.000000e+00> : vector<8x8xf32>
    %53 = vector.multi_reduction <add>, %52, %cst_14 [2] : vector<8x8x32xf32> to vector<8x8xf32>
    %54 = vector.broadcast %15 : f32 to vector<8x8xf32>
    %55 = arith.addf %53, %54 : vector<8x8xf32>
    %56 = tpu.iota {dimensions = array<i32: 1>} : vector<8x8xi32>
    %c0_15 = arith.constant 0 : index
    %c0_16 = arith.constant 0 : index
    %57 = vector.load %arg3[%c0_15, %c0_16] : memref<8x1xi32, #tpu.memory_space<vmem>>, vector<8x1xi32>
    %58 = vector.broadcast %57 : vector<8x1xi32> to vector<8x8xi32>
    %59 = arith.cmpi slt, %56, %58 : vector<8x8xi32>
    %cst_17 = arith.constant -1.000000e+09 : f32
    %60 = vector.broadcast %cst_17 : f32 to vector<8x8xf32>
    %61 = arith.select %59, %55, %60 : vector<8x8xi1>, vector<8x8xf32>
    %cst_18 = arith.constant dense<0xFF800000> : vector<8xf32>
    %62 = vector.multi_reduction <maximumf>, %61, %cst_18 [1] : vector<8x8xf32> to vector<8xf32>
    %63 = vector.shape_cast %62 : vector<8xf32> to vector<8x1xf32>
    %64 = vector.broadcast %63 : vector<8x1xf32> to vector<8x8xf32>
    %65 = arith.subf %61, %64 : vector<8x8xf32>
    %66 = math.exp %65 : vector<8x8xf32>
    %cst_19 = arith.constant dense<0.000000e+00> : vector<8xf32>
    %67 = vector.multi_reduction <add>, %66, %cst_19 [1] : vector<8x8xf32> to vector<8xf32>
    %68 = vector.shape_cast %67 : vector<8xf32> to vector<8x1xf32>
    %69 = vector.shape_cast %66 : vector<8x8xf32> to vector<8x8x1xf32>
    %70 = vector.broadcast %69 : vector<8x8x1xf32> to vector<8x8x32xf32>
    %71 = arith.mulf %70, %0 : vector<8x8x32xf32>
    %cst_20 = arith.constant dense<0.000000e+00> : vector<8x32xf32>
    %72 = vector.multi_reduction <add>, %71, %cst_20 [1] : vector<8x8x32xf32> to vector<8x32xf32>
    %73 = tpu.reciprocal %68 : vector<8x1xf32> -> vector<8x1xf32>
    %74 = vector.broadcast %73 : vector<8x1xf32> to vector<8x32xf32>
    %75 = arith.mulf %72, %74 : vector<8x32xf32>
    %76 = arith.mulf %75, %1 : vector<8x32xf32>
    %77 = tpu.concatenate %75, %1, %76 in 1 : vector<8x32xf32>, vector<8x32xf32>, vector<8x32xf32> -> vector<8x96xf32>
    %c0_21 = arith.constant 0 : index
    %c0_22 = arith.constant 0 : index
    %78 = vector.load %arg6[%c0_21, %c0_22] : memref<96x64xf32, #tpu.memory_space<vmem>>, vector<96x64xf32>
    %cst_23 = arith.constant dense<0.000000e+00> : vector<8x64xf32>
    %79 = tpu.matmul %77, %78, %cst_23 {dimension_numbers = #tpu.dot_dimension_numbers<[1], [0], [0], [1], [0, 0, 1, 1], [], []>} : vector<8x96xf32>, vector<96x64xf32>, vector<8x64xf32> -> vector<8x64xf32>
    %80 = vector.shape_cast %10 : vector<64xf32> to vector<1x64xf32>
    %81 = vector.broadcast %80 : vector<1x64xf32> to vector<8x64xf32>
    %82 = arith.addf %79, %81 : vector<8x64xf32>
    %cst_24 = arith.constant 0.000000e+00 : f32
    %83 = vector.broadcast %cst_24 : f32 to vector<8x64xf32>
    %84 = arith.cmpf ogt, %82, %83 : vector<8x64xf32>
    %85 = vector.broadcast %19 : f32 to vector<8x64xf32>
    %86 = arith.mulf %85, %82 : vector<8x64xf32>
    %87 = arith.select %84, %82, %86 : vector<8x64xi1>, vector<8x64xf32>
    %c0_25 = arith.constant 0 : index
    %c0_26 = arith.constant 0 : index
    %88 = vector.load %arg7[%c0_25, %c0_26] : memref<64x32xf32, #tpu.memory_space<vmem>>, vector<64x32xf32>
    %cst_27 = arith.constant dense<0.000000e+00> : vector<8x32xf32>
    %89 = tpu.matmul %87, %88, %cst_27 {dimension_numbers = #tpu.dot_dimension_numbers<[1], [0], [0], [1], [0, 0, 1, 1], [], []>} : vector<8x64xf32>, vector<64x32xf32>, vector<8x32xf32> -> vector<8x32xf32>
    %90 = vector.shape_cast %12 : vector<32xf32> to vector<1x32xf32>
    %91 = vector.broadcast %90 : vector<1x32xf32> to vector<8x32xf32>
    %92 = arith.addf %89, %91 : vector<8x32xf32>
    %cst_28 = arith.constant 0.000000e+00 : f32
    %93 = vector.broadcast %cst_28 : f32 to vector<8x32xf32>
    %94 = arith.cmpf ogt, %92, %93 : vector<8x32xf32>
    %95 = vector.broadcast %20 : f32 to vector<8x32xf32>
    %96 = arith.mulf %95, %92 : vector<8x32xf32>
    %97 = arith.select %94, %92, %96 : vector<8x32xi1>, vector<8x32xf32>
    %98 = vector.shape_cast %14 : vector<32xf32> to vector<1x32xf32>
    %99 = vector.broadcast %98 : vector<1x32xf32> to vector<8x32xf32>
    %100 = arith.mulf %97, %99 : vector<8x32xf32>
    %cst_29 = arith.constant dense<0.000000e+00> : vector<8xf32>
    %101 = vector.multi_reduction <add>, %100, %cst_29 [1] : vector<8x32xf32> to vector<8xf32>
    %102 = vector.shape_cast %101 : vector<8xf32> to vector<8x1xf32>
    %103 = vector.broadcast %16 : f32 to vector<8x1xf32>
    %104 = arith.addf %102, %103 : vector<8x1xf32>
    %c0_30 = arith.constant 0 : index
    %c0_31 = arith.constant 0 : index
    %105 = vector.load %arg10[%c0_30, %c0_31] : memref<8x1xf32, #tpu.memory_space<vmem>>, vector<8x1xf32>
    tpu.vector_store %arg10[%c0_30, %c0_31], %104 {strides = array<i32>} : memref<8x1xf32, #tpu.memory_space<vmem>>, vector<8x1xf32>,
    return
  }
  func.func @transform_0(%arg0: i32) -> (i32, i32, i32) {
    %c0_i32 = arith.constant 0 : i32
    %c0_i32_0 = arith.constant 0 : i32
    %c0_i32_1 = arith.constant 0 : i32
    return %arg0, %c0_i32, %c0_i32_0 : i32, i32, i32
  }
  func.func @transform_1(%arg0: i32) -> (i32, i32) {
    %c0_i32 = arith.constant 0 : i32
    %c0_i32_0 = arith.constant 0 : i32
    return %arg0, %c0_i32 : i32, i32
  }
  func.func @transform_2(%arg0: i32) -> (i32, i32) {
    %c0_i32 = arith.constant 0 : i32
    %c0_i32_0 = arith.constant 0 : i32
    return %arg0, %c0_i32 : i32, i32
  }
  func.func @transform_3(%arg0: i32) -> (i32, i32) {
    %c0_i32 = arith.constant 0 : i32
    %c0_i32_0 = arith.constant 0 : i32
    %c0_i32_1 = arith.constant 0 : i32
    return %c0_i32, %c0_i32_0 : i32, i32
  }
  func.func @transform_4(%arg0: i32) -> (i32, i32) {
    %c0_i32 = arith.constant 0 : i32
    %c0_i32_0 = arith.constant 0 : i32
    %c0_i32_1 = arith.constant 0 : i32
    return %c0_i32, %c0_i32_0 : i32, i32
  }
  func.func @transform_5(%arg0: i32) -> (i32, i32) {
    %c0_i32 = arith.constant 0 : i32
    %c0_i32_0 = arith.constant 0 : i32
    %c0_i32_1 = arith.constant 0 : i32
    return %c0_i32, %c0_i32_0 : i32, i32
  }
  func.func @transform_6(%arg0: i32) -> (i32, i32) {
    %c0_i32 = arith.constant 0 : i32
    %c0_i32_0 = arith.constant 0 : i32
    %c0_i32_1 = arith.constant 0 : i32
    return %c0_i32, %c0_i32_0 : i32, i32
  }
  func.func @transform_7(%arg0: i32) -> (i32, i32) {
    %c0_i32 = arith.constant 0 : i32
    %c0_i32_0 = arith.constant 0 : i32
    %c0_i32_1 = arith.constant 0 : i32
    return %c0_i32, %c0_i32_0 : i32, i32
  }
  func.func @transform_8(%arg0: i32) -> i32 {
    %c0_i32 = arith.constant 0 : i32
    %c0_i32_0 = arith.constant 0 : i32
    return %c0_i32 : i32
  }
  func.func @transform_9(%arg0: i32) -> (i32, i32) {
    %c0_i32 = arith.constant 0 : i32
    %c0_i32_0 = arith.constant 0 : i32
    return %arg0, %c0_i32 : i32, i32
  }
}

</mosaic_0001>

<bundles_post_ra>
// kernel: tpu_custom_call.1
= control target key start
LH: loop header
LB: loop body
LE: loop exit
PB: predicated region body
PF: predicated region fallthrough
CT: control target
= control target key end

     0   :  { %s3347_s0 = inlined_call_operand.hbm [shape: f32[16,8,32], index: 0, kind: input, shape index: {}]   ;;  %s3348_s1 = inlined_call_operand.hbm [shape: f32[16,32], index: 1, kind: input, shape index: {}]   ;;  %s3349_s2 = inlined_call_operand.hbm [shape: s32[16,1], index: 2, kind: input, shape index: {}]   ;;  %s3350_s3 = inlined_call_operand.hbm [shape: f32[128,64], index: 3, kind: input, shape index: {}]   ;;  %s3351_s4 = inlined_call_operand.hbm [shape: f32[64,32], index: 4, kind: input, shape index: {}]   ;;  %s3352_s5 = inlined_call_operand.hbm [shape: f32[96,64], index: 5, kind: input, shape index: {}]   ;;  %s3353_s6 = inlined_call_operand.hbm [shape: f32[64,32], index: 6, kind: input, shape index: {}]   ;;  %s3354_s7 = inlined_call_operand.hbm [shape: f32[6,128], index: 7, kind: input, shape index: {}]   ;;  %s3355_s8 = inlined_call_operand.hbm [shape: f32[6], index: 8, kind: input, shape index: {}]   ;;  %s3356_s9 = inlined_call_operand.hbm [shape: f32[16,1], index: 9, kind: output, shape index: {}]  }
   0x1   :  { %3385 = sst [smem:[#allocation33_spill]] %s3348_s1 }
   0x2   :  { %3386 = sst [smem:[#allocation34_spill]] %s3350_s3 }
   0x3   :  { %3387 = sst [smem:[#allocation35_spill]] %s3352_s5 }
   0x4   :  { %3388 = sst [smem:[#allocation36_spill]] %s3356_s9 }
   0x5   :  { %14 = vsyncpa [#allocation3], 0 }
   0x6   :  { %16 = vsyncpa [#allocation3 + $0x1], 0 }
   0x7   :  { %17 = vsyncpa [#allocation7], 0 }
   0x8   :  { %19 = vsyncpa [#allocation7 + $0x1], 0 }
   0x9   :  { %20 = vsyncpa [#allocation10], 0 }
   0xa   :  { %21 = vsyncpa [#allocation13], 0 }
   0xb   :  { %22 = vsyncpa [#allocation16], 0 }
   0xc   :  { %23 = vsyncpa [#allocation5], 0 }
   0xd   :  { %24 = vsyncpa [#allocation4], 0 }
   0xe   :  { %26 = vsyncpa [#allocation4 + $0x1], 0  ;;  %s2680_s30 = smov 0   ;;  %s2682_s10 = smov 0  }
   0xf   :  { %s2684_s11 = smov 0   ;;  %s2686_s12 = smov 0  }
  0x10 LB: > { %3389 = sst [smem:[#allocation26_spill]] %s2596_s30  ;;  %s2610_s13 = smov [#allocation9]   ;;  %s2608_s12 = sphi %s2686_s12, %s3434_s12   ;;  %s2604_s11 = sphi %s2684_s11, %s3436_s11   ;;  %s2600_s10 = sphi %s2682_s10, %s3438_s10   ;;  %s2596_s30 = sphi %s2680_s30, %s3437_s30  }
  0x11   : > { %3390 = sst [smem:[#allocation27_spill]] %s2604_s11  ;;  %s279_s14 = sshll.u32 %s2610_s13, 4  ;;  %s2706_s14 = int_to_ptr.vmem [resolvable:$true] %s279_s14 }
  0x12   : > { %s2701_s15 = sadd.s32 4294967295, %s2608_s12   ;;  %p1780_p0 = scmp.ge.s32.totalorder %s2608_s12, 1 }
  0x13   : > { %3391 = sst [smem:[#allocation28_spill]] %s2701_s15  ;;  %p3367_p1 = scmp.eq.s32.totalorder %s2701_s15, 0 }
  0x14   : > { %p267_p2 = scmp.lt.s32.totalorder %s2608_s12, 3  ;;  %s2611_s17 = smov [#allocation12]  }
  0x15   : > { %s305_s18 = sshll.u32 %s2611_s17, 4  ;;  %s3394_s3 = sld [smem:[#allocation34_spill]]  ;;  %s2721_s18 = int_to_ptr.vmem [resolvable:$true] %s305_s18 }
  0x16   : > { %p2708_p3 = pnand %p1780_p0, %p267_p2 }
  0x18   : > { %s3392_s16 = scalar_select %p2708_p3, 1, 0 }
  0x19   : > { %p2116_p5 = pneg %p2708_p3 }
  0x1b   : > { %p2717_p6 = pnand %p2116_p5, %p3367_p1  ;;  %s2279_s22 = scalar_lea.hbm %s3394_s3, 2048 }
  0x1c   : > { %p2280_p7 = scmp.ne.s32.totalorder %s3394_s3, %s2279_s22  ;;  %p2286_p11 = scmp.lt.u32.totalorder %s2279_s22, %s3394_s3 }
  0x1d   : > { %s3393_s19 = scalar_select %p2717_p6, 1, 0 }
  0x1e   : > { %p2731_p8 = pneg %p2717_p6 }
  0x20   : > { %s3395_s25 = scalar_select %p2731_p8, 1, 0 }
  0x21   : > { %p2282_p9 = pnand %p2731_p8, %p2280_p7 }
  0x23   : > { %p2283_p10 = pneg %p2282_p9 }
  0x25   : > { %p2288_p12 = pnand %p2286_p11, %p2283_p10 }
  0x27   : > { %2291 = shalt.err (!%p2288_p12)
}
  0x28   : > { %s2292_s28 = scalar_lea.vmem %s2706_s14, 2048  ;;  %p2300_p5 = scmp.lt.s32.totalorder %s2706_s14, %s2706_s14 }
  0x29   : > { %p2293_p13 = scmp.ne.s32.totalorder %s2706_s14, %s2292_s28  ;;  %p2301_p4 = scmp.lt.s32.totalorder %s2292_s28, %s2292_s28 }
  0x2b   : > { %p2295_p0 = pnand %p2293_p13, %p2731_p8  ;;  %p2302_p7 = por %p2301_p4, %p2300_p5 }
  0x2d   : > { %p2296_p2 = pneg %p2295_p0 }
  0x2f   : > { %p2303_p9 = pnand %p2302_p7, %p2296_p2 }
  0x31   : > { %2306 = shalt.err (!%p2303_p9)
}
  0x32   : > { %s3358_s29 = smov 128   ;;  %s3360_s13 = smov 8  }
  0x33   : > { %2119 = dma.hbm_to_vmem [thread:$0]  (!%p2717_p6), %s3394_s3, 2048, %s2706_s14, [#allocation10], %s3358_s29, %s3358_s29, %s3360_s13  }
  0x34   : > { %s3396_s5 = sld [smem:[#allocation35_spill]] }
  0x3a   : > { %s2307_s23 = scalar_lea.hbm %s3396_s5, 1536 }
  0x3b   : > { %p2308_p4 = scmp.ne.s32.totalorder %s3396_s5, %s2307_s23  ;;  %p2314_p12 = scmp.lt.u32.totalorder %s2307_s23, %s3396_s5 }
  0x3d   : > { %p2310_p10 = pnand %p2308_p4, %p2731_p8 }
  0x3f   : > { %p2311_p11 = pneg %p2310_p10 }
  0x41   : > { %p2316_p13 = pnand %p2314_p12, %p2311_p11 }
  0x43   : > { %2319 = shalt.err (!%p2316_p13)
}
  0x44   : > { %s2320_s14 = scalar_lea.vmem %s2721_s18, 1536  ;;  %p2328_p7 = scmp.lt.s32.totalorder %s2721_s18, %s2721_s18 }
  0x45   : > { %p2321_p0 = scmp.ne.s32.totalorder %s2721_s18, %s2320_s14  ;;  %p2329_p9 = scmp.lt.s32.totalorder %s2320_s14, %s2320_s14 }
  0x47   : > { %p2323_p2 = pnand %p2321_p0, %p2731_p8  ;;  %p2330_p4 = por %p2329_p9, %p2328_p7 }
  0x49   : > { %p2324_p5 = pneg %p2323_p2 }
  0x4b   : > { %p2331_p10 = pnand %p2330_p4, %p2324_p5 }
  0x4d   : > { %2334 = shalt.err (!%p2331_p10)
}
  0x4e   : > { %2125 = dma.hbm_to_vmem [thread:$0]  (!%p2717_p6), %s3396_s5, 1536, %s2721_s18, [#allocation13], %s3358_s29, %s3358_s29, %s3360_s13  }
  0x4f   : > { %s1779_s21 = sadd.s32 4294967294, %s2608_s12   ;;  %s2783_s22 = sadd.s32 1, %s2608_s12  }
  0x50   : > { %3397 = sst [smem:[#allocation29_spill]] %s2783_s22  ;;  %s36_s23 = ssub.s32 %s2608_s12, %s2783_s22 }
  0x51   : > { %s39_s24 = sadd.s32 1, %s2604_s11  ;;  %p37_p11 = scmp.eq.s32.totalorder %s36_s23, 0 }
  0x52   : > { %p46_p12 = scmp.ne.s32.totalorder %s2604_s11, %s2600_s10  ;;  %p47_p13 = scmp.eq.s32.totalorder %s2608_s12, 0 }
  0x53   : > { %p52_p0 = scmp.ne.s32.totalorder %s2600_s10, %s2596_s30  ;;  %p254_p7 = scmp.eq.s32.totalorder %s2701_s15, 1 }
  0x54   : > { %s2794_s26 = scalar_select %p37_p11, %s2604_s11, %s39_s24  }
  0x55   : > { %p48_p2 = por %p47_p13, %p46_p12  ;;  %p2798_p5 = por %p3367_p1, %p52_p0 }
  0x56   : > { %3398 = sst [smem:[#allocation30_spill]] %s2794_s26  ;;  %p260_p9 = scmp.eq.s32.totalorder %s1779_s21, 1 }
  0x57   : > { %s3399_s27 = scalar_select %p2798_p5, 1, 0 }
  0x58   : > { %p2155_p4 = scmp.lt.s32.totalorder %s2608_s12, 2  ;;  %s2805_s18 = sand.u32 1, %s2604_s11  }
  0x59   : > { %p2807_p10 = por %p254_p7, %p46_p12  ;;  %p2811_p3 = por %p260_p9, %p52_p0 }
  0x5a   : > { %p2815_p11 = pnand %p2155_p4, %p48_p2  ;;  %s373_s20 = sand.u32 1, %s2608_s12  }
  0x5b   : > { %s3400_s28 = scalar_select %p2807_p10, 1, 0 }
  0x5c   : > { %s3402_s14 = scalar_select %p2811_p3, 1, 0 }
  0x5d   : > { %3401 = sst [smem:[#allocation31_spill]] %s3400_s28  ;;  %s3363_s21 = sshll.u32 %s2805_s18, 3 }
  0x5e   : > { %3403 = sst [smem:[#allocation32_spill]] %s3402_s14  ;;  %s3364_s23 = sshll.u32 %s2608_s12, 7 }
  0x5f   : > { %s3404_s17 = scalar_select %p2815_p11, 1, 0 }
  0x60   : > { %s377_s24 = scalar_lea.vmem [#allocation6], %s3363_s21  ;;  %s3405_s1 = sld [smem:[#allocation33_spill]] }
  0x61   : > { %s384_s29 = sshll.u32 %s377_s24, 4  ;;  %s2833_s26 = scalar_lea.sflag [#allocation7], %s373_s20  ;;  %s2831_s29 = int_to_ptr.vmem [resolvable:$true] %s384_s29 }
  0x62   : > { %p2839_p13 = pneg %p2815_p11 }
  0x64   : > { %s3406_s21 = scalar_select %p2839_p13, 1, 0 }
  0x66   : > { %s2829_s5 = scalar_lea.hbm %s3405_s1, %s3364_s23  ;;  %s2340_s24 = scalar_lea.hbm %s3405_s1, 256 }
  0x67   : > { %s2335_s11 = scalar_lea.hbm %s2829_s5, 128  ;;  %p2341_p7 = scmp.lt.u32.totalorder %s2829_s5, %s3405_s1 }
  0x68   : > { %p2336_p12 = scmp.ne.s32.totalorder %s2829_s5, %s2335_s11  ;;  %p2342_p9 = scmp.lt.u32.totalorder %s2340_s24, %s2335_s11 }
  0x69   : > { %p2344_p1 = scmp.lt.u32.totalorder %s2335_s11, %s2829_s5 }
  0x6a   : > { %p2338_p0 = pnand %p2839_p13, %p2336_p12  ;;  %p2343_p4 = por %p2342_p9, %p2341_p7 }
  0x6c   : > { %p2339_p2 = pneg %p2338_p0  ;;  %p2345_p3 = por %p2344_p1, %p2343_p4 }
  0x6e   : > { %p2346_p10 = pnand %p2345_p3, %p2339_p2 }
  0x70   : > { %2349 = shalt.err (!%p2346_p10)
}
  0x71   : > { %s2350_s20 = scalar_lea.vmem %s2831_s29, 128  ;;  %s2614_s3 = smov [#allocation6]  }
  0x72   : > { %p2351_p12 = scmp.ne.s32.totalorder %s2831_s29, %s2350_s20  ;;  %s2355_s13 = sshll.u32 %s2614_s3, 4  ;;  %s2356_s13 = int_to_ptr.vmem [resolvable:$false] %s2355_s13 }
  0x73   : > { %s2357_s22 = scalar_lea.vmem %s2356_s13, 256  ;;  %p2358_p6 = scmp.lt.s32.totalorder %s2831_s29, %s2356_s13 }
  0x74   : > { %p2353_p0 = pnand %p2351_p12, %p2839_p13  ;;  %p2359_p8 = scmp.lt.s32.totalorder %s2357_s22, %s2350_s20 }
  0x76   : > { %p2354_p5 = pneg %p2353_p0  ;;  %p2360_p7 = por %p2359_p8, %p2358_p6 }
  0x78   : > { %p2361_p9 = pnand %p2360_p7, %p2354_p5 }
  0x7a   : > { %2364 = shalt.err (!%p2361_p9)
}
  0x7b   : > { %2141 = dma.hbm_to_vmem [thread:$0]  (!%p2815_p11), %s2829_s5, 128, %s2831_s29, %s2833_s26  }
  0x7c   : > { %s3407_s11 = sshll.u32 %s2608_s12, 7  ;;  %s2615_s1 = smov [#allocation11]  }
  0x7d   : > { %s2868_s3 = scalar_lea.hbm %s3349_s2, %s3407_s11  ;;  %s292_s13 = sshll.u32 %s2615_s1, 4  ;;  %s293_s13 = int_to_ptr.vmem [resolvable:$true] %s292_s13 }
  0x7e   : > { %s2616_s20 = smov [#allocation14]   ;;  %s2365_s9 = scalar_lea.hbm %s3351_s4, 1024 }
  0x7f   : > { %s318_s22 = sshll.u32 %s2616_s20, 4  ;;  %p2366_p1 = scmp.ne.s32.totalorder %s3351_s4, %s2365_s9  ;;  %s2870_s22 = int_to_ptr.vmem [resolvable:$true] %s318_s22 }
  0x80   : > { %p3408_p3 = scmp.ne.s32.totalorder %s3395_s25, 0  ;;  %p2372_p5 = scmp.lt.u32.totalorder %s2365_s9, %s3351_s4 }
  0x82   : > { %p2368_p6 = pnand %p2366_p1, %p3408_p3 }
  0x84   : > { %p2369_p8 = pneg %p2368_p6 }
  0x86   : > { %p2374_p10 = pnand %p2372_p5, %p2369_p8 }
  0x88   : > { %2377 = shalt.err (!%p2374_p10)
}
  0x89   : > { %s2378_s1 = scalar_lea.vmem %s293_s13, 1024  ;;  %p2386_p0 = scmp.lt.s32.totalorder %s293_s13, %s293_s13 }
  0x8a   : > { %p2379_p2 = scmp.ne.s32.totalorder %s293_s13, %s2378_s1  ;;  %p2387_p7 = scmp.lt.s32.totalorder %s2378_s1, %s2378_s1 }
  0x8c   : > { %p2381_p4 = pnand %p2379_p2, %p3408_p3  ;;  %p2388_p9 = por %p2387_p7, %p2386_p0 }
  0x8e   : > { %p2382_p12 = pneg %p2381_p4 }
  0x90   : > { %p2389_p11 = pnand %p2388_p9, %p2382_p12 }
  0x92   : > { %2392 = shalt.err (!%p2389_p11)
}
  0x93   : > { %p3409_p1 = scmp.ne.s32.totalorder %s3393_s19, 0  ;;  %s3410_s30 = smov 8  }
  0x94   : > { %s3411_s15 = smov 128   ;;  %s2393_s23 = scalar_lea.hbm %s3353_s6, 1024 }
  0x95   : > { %2122 = dma.hbm_to_vmem [thread:$0]  (!%p3409_p1), %s3351_s4, 1024, %s293_s13, [#allocation10], %s3411_s15, %s3411_s15, %s3410_s30  }
  0x96   : > { %p2394_p6 = scmp.ne.s32.totalorder %s3353_s6, %s2393_s23  ;;  %p2400_p5 = scmp.lt.u32.totalorder %s2393_s23, %s3353_s6 }
  0x98   : > { %p2396_p11 = pnand %p2394_p6, %p3408_p3 }
  0x9a   : > { %p2397_p8 = pneg %p2396_p11 }
  0x9c   : > { %p2402_p10 = pnand %p2400_p5, %p2397_p8 }
  0x9e   : > { %2405 = shalt.err (!%p2402_p10)
}
  0x9f   : > { %s2406_s13 = scalar_lea.vmem %s2870_s22, 1024  ;;  %p2414_p0 = scmp.lt.s32.totalorder %s2870_s22, %s2870_s22 }
  0xa0   : > { %p2407_p2 = scmp.ne.s32.totalorder %s2870_s22, %s2406_s13  ;;  %p2415_p7 = scmp.lt.s32.totalorder %s2406_s13, %s2406_s13 }
  0xa2   : > { %p2409_p4 = pnand %p2407_p2, %p3408_p3  ;;  %p2416_p9 = por %p2415_p7, %p2414_p0 }
  0xa4   : > { %p2410_p12 = pneg %p2409_p4 }
  0xa6   : > { %p2417_p6 = pnand %p2416_p9, %p2410_p12 }
  0xa8   : > { %2420 = shalt.err (!%p2417_p6)
}
  0xa9   : > { %2128 = dma.hbm_to_vmem [thread:$0]  (!%p3409_p1), %s3353_s6, 1024, %s2870_s22, [#allocation13], %s3411_s15, %s3411_s15, %s3410_s30  }
  0xaa   : > { %s2617_s9 = smov [#allocation15]   ;;  %s1788_s11 = sshll.u32 %s2805_s18, 6 }
  0xab   : > { %s332_s14 = sshll.u32 %s2617_s9, 4  ;;  %s2421_s20 = scalar_lea.hbm %s3354_s7, 128  ;;  %s333_s14 = int_to_ptr.vmem [resolvable:$true] %s332_s14 }
  0xac   : > { %p2422_p11 = scmp.ne.s32.totalorder %s3354_s7, %s2421_s20  ;;  %p2428_p10 = scmp.lt.u32.totalorder %s2421_s20, %s3354_s7 }
  0xae   : > { %p2424_p8 = pnand %p2422_p11, %p3408_p3 }
  0xb0   : > { %p2425_p5 = pneg %p2424_p8 }
  0xb2   : > { %p2430_p2 = pnand %p2428_p10, %p2425_p5 }
  0xb4   : > { %2433 = shalt.err (!%p2430_p2)
}
  0xb5   : > { %s2434_s22 = scalar_lea.vmem %s333_s14, 128  ;;  %p2442_p7 = scmp.lt.s32.totalorder %s333_s14, %s333_s14 }
  0xb6   : > { %p2435_p4 = scmp.ne.s32.totalorder %s333_s14, %s2434_s22  ;;  %p2443_p9 = scmp.lt.s32.totalorder %s2434_s22, %s2434_s22 }
  0xb8   : > { %p2437_p12 = pnand %p2435_p4, %p3408_p3  ;;  %p2444_p6 = por %p2443_p9, %p2442_p7 }
  0xba   : > { %p2438_p0 = pneg %p2437_p12 }
  0xbc   : > { %p2445_p13 = pnand %p2444_p6, %p2438_p0 }
  0xbe   : > { %2448 = shalt.err (!%p2445_p13)
}
  0xbf   : > { %2131 = dma.hbm_to_vmem [thread:$0]  (!%p3409_p1), %s3354_s7, 128, %s333_s14, [#allocation16]  }
  0xc0   : > { %s2449_s20 = scalar_lea.hbm %s3355_s8, 16 }
  0xc1   : > { %p2450_p11 = scmp.ne.s32.totalorder %s3355_s8, %s2449_s20  ;;  %p2456_p13 = scmp.lt.u32.totalorder %s2449_s20, %s3355_s8 }
  0xc3   : > { %p2452_p8 = pnand %p2450_p11, %p3408_p3 }
  0xc5   : > { %p2453_p5 = pneg %p2452_p8 }
  0xc7   : > { %p2458_p10 = pnand %p2456_p13, %p2453_p5 }
  0xc9   : > { %2461 = shalt.err (!%p2458_p10)
}
  0xca   : > { %s2618_s22 = smov [#allocation17]   ;;  %s1825_s25 = sshll.u32 %s2608_s12, 10 }
  0xcb   : > { %2134 = dma.hbm_to_smem (!%p3409_p1), %s3355_s8, 16, %s2618_s22, [#allocation5]  }
  0xcc   : > { %s2958_s24 = scalar_lea.hbm %s3347_s0, %s1825_s25  ;;  %s356_s19 = scalar_lea.vmem [#allocation2], %s1788_s11 }
  0xcd   : > { %s363_s20 = sshll.u32 %s356_s19, 4  ;;  %s3412_s5 = sshll.u32 %s2805_s18, 3  ;;  %s2962_s20 = int_to_ptr.vmem [resolvable:$true] %s363_s20 }
  0xce   : > { %s2966_s29 = scalar_lea.vmem [#allocation8], %s3412_s5  ;;  %s353_s1 = scalar_lea.sflag [#allocation3], %s2805_s18 }
  0xcf   : > { %s402_s13 = sshll.u32 %s2966_s29, 4  ;;  %s2462_s22 = scalar_lea.hbm %s2958_s24, 1024  ;;  %s403_s13 = int_to_ptr.vmem [resolvable:$true] %s402_s13 }
  0xd0   : > { %p2463_p3 = scmp.ne.s32.totalorder %s2958_s24, %s2462_s22  ;;  %p3413_p1 = scmp.ne.s32.totalorder %s3406_s21, 0 }
  0xd1   : > { %s2467_s25 = scalar_lea.hbm %s3347_s0, 2048  ;;  %p2468_p12 = scmp.lt.u32.totalorder %s2958_s24, %s3347_s0 }
  0xd2   : > { %p2465_p2 = pnand %p2463_p3, %p3413_p1  ;;  %p2469_p0 = scmp.lt.u32.totalorder %s2467_s25, %s2462_s22 }
  0xd3   : > { %p2471_p9 = scmp.lt.u32.totalorder %s2462_s22, %s2958_s24 }
  0xd4   : > { %p2466_p4 = pneg %p2465_p2  ;;  %p2470_p7 = por %p2469_p0, %p2468_p12 }
  0xd6   : > { %p2472_p6 = por %p2471_p9, %p2470_p7 }
  0xd8   : > { %p2473_p11 = pnand %p2472_p6, %p2466_p4 }
  0xda   : > { %2476 = shalt.err (!%p2473_p11)
}
  0xdb   : > { %s2477_s23 = scalar_lea.vmem %s2962_s20, 1024  ;;  %s2619_s19 = smov [#allocation2]  }
  0xdc   : > { %p2478_p8 = scmp.ne.s32.totalorder %s2962_s20, %s2477_s23  ;;  %s2482_s5 = sshll.u32 %s2619_s19, 4  ;;  %s2483_s5 = int_to_ptr.vmem [resolvable:$false] %s2482_s5 }
  0xdd   : > { %s2484_s14 = scalar_lea.vmem %s2483_s5, 2048  ;;  %p2485_p10 = scmp.lt.s32.totalorder %s2962_s20, %s2483_s5 }
  0xde   : > { %p2480_p5 = pnand %p2478_p8, %p3413_p1  ;;  %p2486_p3 = scmp.lt.s32.totalorder %s2484_s14, %s2477_s23 }
  0xe0   : > { %p2481_p13 = pneg %p2480_p5  ;;  %p2487_p2 = por %p2486_p3, %p2485_p10 }
  0xe2   : > { %p2488_p12 = pnand %p2487_p2, %p2481_p13 }
  0xe4   : > { %2491 = shalt.err (!%p2488_p12)
}
  0xe5   : > { %p3414_p4 = scmp.ne.s32.totalorder %s3404_s17, 0  ;;  %s2492_s22 = scalar_lea.hbm %s2868_s3, 128 }
  0xe6   : > { %p2493_p0 = scmp.ne.s32.totalorder %s2868_s3, %s2492_s22  ;;  %s2497_s18 = scalar_lea.hbm %s3349_s2, 256 }
  0xe7   : > { %2138 = dma.hbm_to_vmem [thread:$0]  (!%p3414_p4), %s2958_s24, 1024, %s2962_s20, %s353_s1, %s3411_s15, %s3411_s15, %s3410_s30  }
  0xe8   : > { %p2495_p7 = pnand %p2493_p0, %p3413_p1  ;;  %p2498_p6 = scmp.lt.u32.totalorder %s2868_s3, %s3349_s2 }
  0xe9   : > { %p2499_p11 = scmp.lt.u32.totalorder %s2497_s18, %s2492_s22  ;;  %p2501_p5 = scmp.lt.u32.totalorder %s2492_s22, %s2868_s3 }
  0xea   : > { %p2496_p9 = pneg %p2495_p7 }
  0xeb   : > { %p2500_p8 = por %p2499_p11, %p2498_p6 }
  0xed   : > { %p2502_p13 = por %p2501_p5, %p2500_p8 }
  0xef   : > { %p2503_p10 = pnand %p2502_p13, %p2496_p9 }
  0xf1   : > { %2506 = shalt.err (!%p2503_p10)
}
  0xf2   : > { %s2507_s30 = scalar_lea.vmem %s403_s13, 128  ;;  %s2620_s15 = smov [#allocation8]  }
  0xf3   : > { %p2508_p3 = scmp.ne.s32.totalorder %s403_s13, %s2507_s30  ;;  %s2512_s24 = sshll.u32 %s2620_s15, 4  ;;  %s2513_s24 = int_to_ptr.vmem [resolvable:$false] %s2512_s24 }
  0xf4   : > { %s2514_s20 = scalar_lea.vmem %s2513_s24, 256  ;;  %p2515_p0 = scmp.lt.s32.totalorder %s403_s13, %s2513_s24 }
  0xf5   : > { %p2510_p2 = pnand %p2508_p3, %p3413_p1  ;;  %p2516_p7 = scmp.lt.s32.totalorder %s2514_s20, %s2507_s30 }
  0xf7   : > { %p2511_p12 = pneg %p2510_p2  ;;  %p2517_p4 = por %p2516_p7, %p2515_p0 }
  0xf9   : > { %p2518_p6 = pnand %p2517_p4, %p2511_p12 }
  0xfb   : > { %2521 = shalt.err (!%p2518_p6)
}
  0xfc   : > { %p3415_p11 = scmp.ne.s32.totalorder %s3404_s17, 0  ;;  %p3416_p9 = scmp.ne.s32.totalorder %s3392_s16, 0 }
  0xfd   : > { %s3019_s21 = sand.u32 (!%p3416_p9), 1, %s2600_s10   ;;  %p3417_p1 = scmp.ne.s32.totalorder (!%p3416_p9), %s3399_s27, 0 }
  0xfe   : > { %2144 = dma.hbm_to_vmem [thread:$0]  (!%p3415_p11), %s2868_s3, 128, %s403_s13, %s2833_s26  }
  0xff   : > { %411 = sbr.rel (%p3416_p9) target bundleno = 2083 (0x823), region = 56  ;;  %s1796_s29 = sshll.u32 (!%p3416_p9), %s3019_s21, 6 }
 0x100   : > { %s414_s1 = scalar_lea.sflag (!%p3416_p9), [#allocation3], %s3019_s21  ;;  %s3023_s23 = scalar_lea.vmem (!%p3416_p9), [#allocation2], %s1796_s29 }
 0x106   : > { %2567 = dma.done.wait (%p3417_p1), %s414_s1, 1024  }
 0x107   : > { %2569 = vsyncadd (%p3417_p1), %s414_s1, 4294966272  ;;  %s3418_s17 = sld [smem:[#allocation28_spill]]  ;;  %s3031_s26 = sshll.u32 %s3019_s21, 3 }
 0x108   : > { %s426_s13 = scalar_lea.vmem [#allocation6], %s3031_s26 }
 0x10d   : > { %s422_s16 = sand.u32 1, %s3418_s17  }
 0x10e   : > { %s423_s3 = scalar_lea.sflag [#allocation7], %s422_s16 }
 0x10f   : > { %2571 = dma.done.wait (%p3417_p1), %s423_s3, 256  }
 0x110   : > { %2573 = vsyncadd (%p3417_p1), %s423_s3, 4294967040  ;;  %s435_s19 = scalar_lea.vmem [#allocation8], %s3031_s26  ;;  %p3419_p4 = scmp.eq.s32.totalorder %s3418_s17, 0 }
 0x112   : > { %2575 = dma.done.wait (%p3419_p4), [#allocation10], 3072   ;;  %p3420_p8 = pmov %p3419_p4 }
 0x113   : > { %p3421_p5 = pmov %p3419_p4 }
 0x114   : > { %2577 = vsyncadd (%p3420_p8), [#allocation10], 4294964224 }
 0x115   : > { %2579 = dma.done.wait (%p3421_p5), [#allocation13], 2560   ;;  %p3422_p13 = pmov %p3419_p4 }
 0x116   : > { %p3423_p10 = pmov %p3419_p4 }
 0x117   : > { %2581 = vsyncadd (%p3422_p13), [#allocation13], 4294964736 }
 0x118   : > { %2583 = dma.done.wait (%p3423_p10), [#allocation16], 128   ;;  %p3424_p3 = pmov %p3419_p4 }
 0x11a   : > { %2585 = vsyncadd (%p3424_p3), [#allocation16], 4294967168  ;;  %p3425_p2 = pmov %p3424_p3 }
 0x11c   : > { %2587 = dma.done.wait (%p3425_p2), [#allocation5], 16   ;;  %p3426_p12 = pmov %p3425_p2 }
 0x11e   : > { %2589 = vsyncadd (%p3426_p12), [#allocation5], 4294967280 }
 0x11f   : > { %464 = sfence }
 0x120   : > { %v527_v0 = vlaneseq  ;;  %v2621_v1 = vmov 1966171168   ;;  %v3057_v3 = vld [vmem:[%s426_s13] sm:$0xff]  ;;  %v745_v9 = vld [vmem:[#allocation9 + $0x10] sm:$0xff]  ;;  %v746_v11 = vld [vmem:[#allocation9 + $0x18] sm:$0xff]  ;;  %s2622_s27 = smov 32  }
 0x121   : > { %v525_v2 = vunpack.c.l.s4 %v2621_v1  ;;  %v523_v6 = vcombine.high %v3057_v3, %v3057_v3  ;;  %v743_v7 = vld [vmem:[#allocation9] sm:$0xff]  ;;  %v744_v8 = vld [vmem:[#allocation9 + $0x8] sm:$0xff]  ;;  %v2010_v13 = vpack.c.bf16 %v746_v11, %v745_v9  ;;  %v749_v24 = vld [vmem:[#allocation9 + $0x30] sm:$0xff]  ;;  %s2623_s5 = smov 96   ;;  %s2624_s14 = smov 64   ;;  %vm716_vm0 = vcmask 261120  }
 0x122   : > { %v3060_v4 = vshrl.u32 %v527_v0, 7  ;;  %v2006_v10 = vpack.c.bf16 %v744_v8, %v743_v7  ;;  %v747_v14 = vld [vmem:[#allocation9 + $0x20] sm:$0xff]  ;;  %v748_v15 = vld [vmem:[#allocation9 + $0x28] sm:$0xff]  ;;  %v750_v25 = vld [vmem:[#allocation9 + $0x38] sm:$0xff]  ;;  %vm725_vm1 = vcmask 523264   ;;  %vm734_vm2 = vcmask 785408  }
 0x123   : > { %v526_v5 = vunpack.c.0.s8 %v525_v2  ;;  %v2014_v19 = vpack.c.bf16 %v748_v15, %v747_v14  ;;  %v3072_v26 = vld [vmem:[%s3023_s23] sm:$0xff]  ;;  %v3076_v31 = vld [vmem:[%s3023_s23 + $0x8] sm:$0xff]  ;;  %v2018_v33 = vpack.c.bf16 %v750_v25, %v749_v24  ;;  %v753_v51 = vld [vmem:[#allocation9 + $0x50] sm:$0xff]  ;;  %s1807_s22 = sld [smem:[#allocation17 + $0x2]]  ;;  %s1808_s28 = sld [smem:[#allocation17 + $0x3]] }
 0x124   : > { %2007 = vmatprep.subr.bf16.mxu0 %v2006_v10  ;;  %v3067_v17 = vsub.s32 0, %v3060_v4  ;;  %v751_v38 = vld [vmem:[#allocation9 + $0x40] sm:$0xff]  ;;  %v752_v39 = vld [vmem:[#allocation9 + $0x48] sm:$0xff]  ;;  %v754_v52 = vld [vmem:[#allocation9 + $0x58] sm:$0xff]  ;;  %s516_s25 = sld [smem:[#allocation17]]  ;;  %s1809_s18 = sld [smem:[#allocation17 + $0x4]] }
 0x125   : > { %v529_v12 = vsub.s32 %v526_v5, %v3060_v4  ;;  %2009 = vmatpush3.bf16.msra.mxu0 %v2006_v10  ;;  %v3087_v44 = vld [vmem:[%s3023_s23 + $0x20] sm:$0xff]  ;;  %v3090_v45 = vld [vmem:[%s3023_s23 + $0x28] sm:$0xff]  ;;  %v2022_v46 = vpack.c.bf16 %v752_v39, %v751_v38  ;;  %v3096_v53 = vld [vmem:[%s3023_s23 + $0x10] sm:$0xff]  ;;  %v2026_v59 = vpack.c.bf16 %v754_v52, %v753_v51  ;;  %s1810_s9 = sld [smem:[#allocation17 + $0x5]]  ;;  %s1806_s30 = sld [smem:[#allocation17 + $0x1]] }
 0x126   : > { %2011 = vmatprep.subr.bf16.mxu0 %v2010_v13  ;;  %v3099_v54 = vld [vmem:[%s3023_s23 + $0x18] sm:$0xff]  ;;  %v755_v1 = vld [vmem:[#allocation9 + $0x60] sm:$0xff]  ;;  %v756_v2 = vld [vmem:[#allocation9 + $0x68] sm:$0xff]  ;;  %s3427_s11 = sld [smem:[#allocation31_spill]]  ;;  %s1822_s15 = sshll.u32 %s3418_s17, 7 }
 0x127   : > { %v530_v16 = vrot.slane %v3057_v3, %v529_v12  ;;  %v537_v18 = vrot.slane %v523_v6, %v529_v12  ;;  %v2030_v9 = vpack.c.bf16 %v756_v2, %v755_v1  ;;  %v757_v14 = vld [vmem:[#allocation9 + $0x70] sm:$0xff]  ;;  %v758_v15 = vld [vmem:[#allocation9 + $0x78] sm:$0xff]  ;;  %v893_v25 = vld [vmem:[#allocation11] sm:$0xff]  ;;  %s504_s24 = scalar_lea.vmem [#allocation18], %s3031_s26  ;;  %s1593_s3 = scalar_lea.sflag [#allocation4], %s3019_s21 }
 0x128   : > { %s1606_s20 = sshll.u32 %s504_s24, 4  ;;  %s2629_s17 = smov [#allocation18]   ;;  %s3305_s20 = int_to_ptr.vmem [resolvable:$true] %s1606_s20 }
 0x129   : > { %v538_v20 = vcombine.high %v530_v16, %v530_v16  ;;  %v546_v21 = vrot.slane %v530_v16, %v529_v12  ;;  %v539_v22 = vcombine.high %v537_v18, %v537_v18  ;;  %v3069_v23 = vrot.slane %v537_v18, %v529_v12  ;;  %2013 = vmatpush3.bf16.msra.mxu0 %v2010_v13  ;;  %v3118_v16 = vld [vmem:[%s3023_s23 + $0x30] sm:$0xff]  ;;  %v3121_v18 = vld [vmem:[%s3023_s23 + $0x38] sm:$0xff]  ;;  %s3428_s23 = sld [smem:[#allocation36_spill]]  ;;  %s2526_s26 = sshll.u32 %s2629_s17, 4  ;;  %s2527_s26 = int_to_ptr.vmem [resolvable:$false] %s2526_s26 }
 0x12a   : > { %2015 = vmatprep.subr.bf16.mxu0 %v2014_v19  ;;  %p2529_p9 = scmp.lt.s32.totalorder %s3305_s20, %s2527_s26 }
 0x12b   : > { %v560_v27 = vrot.slane %v538_v20, %v529_v12  ;;  %v568_v28 = vcombine.high %v546_v21, %v546_v21  ;;  %v575_v29 = vrot.slane %v546_v21, %v3067_v17  ;;  %v567_v30 = vrot.slane %v539_v22, %v529_v12 }
 0x12c   : > { %v591_v32 = vrot.slane %v3069_v23, %v3067_v17  ;;  %v569_v58 = vcombine.high %v3069_v23, %v3069_v23  ;;  %v2034_v20 = vpack.c.bf16 %v758_v15, %v757_v14  ;;  %p3429_p7 = scmp.ne.s32.totalorder %s3427_s11, 0 }
 0x12d   : > { %v579_v34 = vrot.slane %v560_v27, %v3067_v17  ;;  %v570_v35 = vcombine.high %v560_v27, %v560_v27  ;;  %v620_v36 = vmul.f32 %v575_v29, %v3072_v26  ;;  %v595_v37 = vrot.slane %v567_v30, %v3067_v17  ;;  %2017 = vmatpush3.bf16.msra.mxu0 %v2014_v19  ;;  %v894_v27 = vld [vmem:[#allocation11 + $0x8] sm:$0xff] }
 0x12e   : > { %v583_v42 = vrot.slane %v568_v28, %v3067_v17  ;;  %2019 = vmatprep.subr.bf16.mxu0 %v2018_v33  ;;  %v612_v49 = vsub.f32 %v3072_v26, %v575_v29  ;;  %v616_v56 = vsub.f32 %v3087_v44, %v591_v32  ;;  %v571_v63 = vcombine.high %v567_v30, %v567_v30  ;;  %v895_v28 = vld [vmem:[#allocation11 + $0x10] sm:$0xff] }
 0x12f   : > { %v2211_v40 = vpack.i.bf16 %v579_v34, %v575_v29  ;;  %v621_v41 = vmul.f32 %v579_v34, %v3076_v31  ;;  %v587_v43 = vrot.slane %v570_v35, %v3067_v17  ;;  %v2216_v48 = vpack.i.bf16 %v595_v37, %v591_v32  ;;  %s3303_s16 = scalar_lea.hbm %s3428_s23, %s1822_s15 }
 0x130   : > { %v613_v50 = vsub.f32 %v3076_v31, %v579_v34  ;;  %v617_v57 = vsub.f32 %v3090_v45, %v595_v37  ;;  %v614_v61 = vsub.f32 %v3096_v53, %v583_v42  ;;  %v622_v6 = vmul.f32 %v583_v42, %v3096_v53 }
 0x131   : > { %2212 = vrot.lane.b32.xlu0 %v2211_v40, %s2622_s27  ;;  %v2226_v47 = vpack.i.bf16 %v621_v41, %v620_v36  ;;  %v2231_v55 = vpack.i.bf16 %v587_v43, %v583_v42  ;;  %2021 = vmatpush3.bf16.msra.mxu0 %v2018_v33  ;;  %v615_v62 = vsub.f32 %v3099_v54, %v587_v43  ;;  %v896_v33 = vld [vmem:[#allocation11 + $0x18] sm:$0xff] }
 0x132   : > { %2023 = vmatprep.subr.bf16.mxu0 %v2022_v46  ;;  %v2221_v60 = vpack.i.bf16 %v613_v50, %v612_v49  ;;  %v2236_v5 = vpack.i.bf16 %v617_v57, %v616_v56  ;;  %v623_v7 = vmul.f32 %v587_v43, %v3099_v54  ;;  %v624_v8 = vmul.f32 %v591_v32, %v3087_v44 }
 0x133   : > { %2227 = vrot.lane.b32.xlu1 %v2226_v47, %s2623_s5  ;;  %v2241_v10 = vpack.i.bf16 %v615_v62, %v614_v61  ;;  %v625_v11 = vmul.f32 %v595_v37, %v3090_v45  ;;  %v599_v12 = vrot.slane %v569_v58, %v3067_v17  ;;  %v603_v13 = vrot.slane %v571_v63, %v3067_v17 }
 0x134   : > { %v2251_v19 = vpack.i.bf16 %v623_v7, %v622_v6  ;;  %v2038_v32 = vpack.c.bf16 %v894_v27, %v893_v25  ;;  %v2042_v34 = vpack.c.bf16 %v896_v33, %v895_v28 }
 0x135   : > { %2217 = vrot.lane.b32.xlu0 %v2216_v48, %s2622_s27  ;;  %2025 = vmatpush3.bf16.msra.mxu0 %v2022_v46  ;;  %v2246_v21 = vpack.i.bf16 %v625_v11, %v624_v8  ;;  %v618_v22 = vsub.f32 %v3118_v16, %v599_v12  ;;  %v619_v23 = vsub.f32 %v3121_v18, %v603_v13 }
 0x136   : > { %2027 = vmatprep.subr.bf16.mxu0 %v2026_v59  ;;  %v626_v24 = vmul.f32 %v599_v12, %v3118_v16  ;;  %v2256_v29 = vpack.i.bf16 %v603_v13, %v599_v12  ;;  %v627_v30 = vmul.f32 %v603_v13, %v3121_v18  ;;  %2039 = vmatprep.subr.bf16.mxu1 %v2038_v32 }
 0x137   : > { %2232 = vrot.lane.b32.xlu1 %v2231_v55, %s2622_s27  ;;  %v2261_v35 = vpack.i.bf16 %v619_v23, %v618_v22  ;;  %2041 = vmatpush3.bf16.msra.mxu1 %v2038_v32 }
 0x138   : > { %v2266_v36 = vpack.i.bf16 %v627_v30, %v626_v24  ;;  %2043 = vmatprep.subr.bf16.mxu1 %v2042_v34 }
 0x139   : > { %2222 = vrot.lane.b32.xlu0 %v2221_v60, %s2624_s14  ;;  %2029 = vmatpush3.bf16.msra.mxu0 %v2026_v59 }
 0x13a   : > { %2031 = vmatprep.subr.bf16.mxu0 %v2030_v9 }
 0x13b   : > { %2237 = vrot.lane.b32.xlu1 %v2236_v5, %s2624_s14  ;;  %2045 = vmatpush3.bf16.msra.mxu1 %v2042_v34 }
 0x13d   : > { %2242 = vrot.lane.b32.xlu0 %v2241_v10, %s2624_s14  ;;  %2033 = vmatpush3.bf16.msra.mxu0 %v2030_v9 }
 0x13e   : > { %2035 = vmatprep.subr.bf16.mxu0 %v2034_v20 }
 0x13f   : > { %2252 = vrot.lane.b32.xlu1 %v2251_v19, %s2623_s5 }
 0x141   : > { %2247 = vrot.lane.b32.xlu0 %v2246_v21, %s2623_s5  ;;  %2037 = vmatpush3.bf16.msra.mxu0 %v2034_v20 }
 0x143   : > { %2257 = vrot.lane.b32.xlu1 %v2256_v29, %s2622_s27 }
 0x145   : > { %2262 = vrot.lane.b32.xlu0 %v2261_v35, %s2624_s14 }
 0x147   : > { %2267 = vrot.lane.b32.xlu1 %v2266_v36, %s2623_s5 }
 0x1a3   : > { %v2213_v37 = vpop.permute.xlu0 %2212 }
 0x1a4   : > { %v2215_v40 = vunpack.i.h.bf16 %v2213_v37  ;;  %v2214_v41 = vunpack.i.l.bf16 %v2213_v37 }
 0x1a5   : > { %v2228_v38 = vpop.permute.xlu1 %2227 }
 0x1a6   : > { %v2230_v46 = vunpack.i.h.bf16 %v2228_v38  ;;  %v2229_v47 = vunpack.i.l.bf16 %v2228_v38  ;;  %v717_v55 = vsel %vm716_vm0, %v3072_v26, %v2214_v41  ;;  %v718_v56 = vsel %vm716_vm0, %v3076_v31, %v2215_v40 }
 0x1a7   : > { %v2218_v39 = vpop.permute.xlu0 %2217 }
 0x1a8   : > { %v2219_v62 = vunpack.i.l.bf16 %v2218_v39  ;;  %v2220_v2 = vunpack.i.h.bf16 %v2218_v39 }
 0x1a9   : > { %v2233_v42 = vpop.permute.xlu1 %2232 }
 0x1aa   : > { %v2235_v50 = vunpack.i.h.bf16 %v2233_v42  ;;  %v2234_v51 = vunpack.i.l.bf16 %v2233_v42  ;;  %v721_v21 = vsel %vm716_vm0, %v3087_v44, %v2219_v62  ;;  %v722_v29 = vsel %vm716_vm0, %v3090_v45, %v2220_v2 }
 0x1ab   : > { %v2223_v43 = vpop.permute.xlu0 %2222 }
 0x1ac   : > { %v2225_v48 = vunpack.i.h.bf16 %v2223_v43  ;;  %v2224_v49 = vunpack.i.l.bf16 %v2223_v43  ;;  %v719_v7 = vsel %vm716_vm0, %v3096_v53, %v2234_v51  ;;  %v720_v8 = vsel %vm716_vm0, %v3099_v54, %v2235_v50  ;;  %v899_v50 = vld [vmem:[#allocation11 + $0x30] sm:$0xff]  ;;  %v900_v51 = vld [vmem:[#allocation11 + $0x38] sm:$0xff] }
 0x1ad   : > { %v2238_v52 = vpop.permute.xlu1 %2237 }
 0x1ae   : > { %v726_v57 = vsel %vm725_vm1, %v717_v55, %v2224_v49  ;;  %v727_v58 = vsel %vm725_vm1, %v718_v56, %v2225_v48  ;;  %v2239_v5 = vunpack.i.l.bf16 %v2238_v52  ;;  %v2240_v13 = vunpack.i.h.bf16 %v2238_v52  ;;  %v898_v48 = vld [vmem:[#allocation11 + $0x28] sm:$0xff]  ;;  %v3166_v55 = vld [vmem:[#allocation15] sm:$0x3f] }
 0x1af   : > { %v2243_v59 = vpop.permute.xlu0 %2242  ;;  %v735_v60 = vsel %vm734_vm2, %v726_v57, %v2229_v47  ;;  %v736_v61 = vsel %vm734_vm2, %v727_v58, %v2230_v46  ;;  %v897_v47 = vld [vmem:[#allocation11 + $0x20] sm:$0xff]  ;;  %v2050_v52 = vpack.c.bf16 %v900_v51, %v899_v50  ;;  %v762_v56 = vrot.slane %v3166_v55, %v3067_v17 }
 0x1b0   : > { %v2245_v63 = vunpack.i.h.bf16 %v2243_v59  ;;  %v2244_v1 = vunpack.i.l.bf16 %v2243_v59  ;;  %1920 = vmatprep.mubr.f32.mxu0 %v735_v60  ;;  %v730_v24 = vsel %vm725_vm1, %v721_v21, %v2239_v5  ;;  %v731_v32 = vsel %vm725_vm1, %v722_v29, %v2240_v13 }
 0x1b1   : > { %v2253_v6 = vpop.permute.xlu1 %2252  ;;  %1921 = vmatmul.mubr.f32.vlgmr.msra.gmra.mrb[0].mxu0 %v736_v61  ;;  %v2046_v49 = vpack.c.bf16 %v898_v48, %v897_v47  ;;  %v876_v58 = vstv %s1807_s22 }
 0x1b2   : > { %v2255_v9 = vunpack.i.h.bf16 %v2253_v6  ;;  %v2254_v10 = vunpack.i.l.bf16 %v2253_v6  ;;  %v728_v11 = vsel %vm725_vm1, %v719_v7, %v2244_v1  ;;  %v729_v12 = vsel %vm725_vm1, %v720_v8, %v2245_v63 }
 0x1b3   : > { %v2248_v14 = vpop.permute.xlu0 %2247  ;;  %2047 = vmatprep.subr.bf16.mxu1 %v2046_v49 }
 0x1b4   : > { %v2249_v15 = vunpack.i.l.bf16 %v2248_v14  ;;  %v737_v19 = vsel %vm734_vm2, %v728_v11, %v2254_v10  ;;  %v738_v20 = vsel %vm734_vm2, %v729_v12, %v2255_v9  ;;  %v2250_v22 = vunpack.i.h.bf16 %v2248_v14  ;;  %2049 = vmatpush3.bf16.msra.mxu1 %v2046_v49 }
 0x1b5   : > { %v2258_v23 = vpop.permute.xlu1 %2257  ;;  %1923 = vmatprep.mubr.f32.mxu0 %v737_v19  ;;  %2051 = vmatprep.subr.bf16.mxu1 %v2050_v52 }
 0x1b6   : > { %v2260_v25 = vunpack.i.h.bf16 %v2258_v23  ;;  %v2259_v27 = vunpack.i.l.bf16 %v2258_v23  ;;  %1924 = vmatmul.mubr.f32.gmra.mrb[2].mxu0 %v738_v20  ;;  %v739_v28 = vsel %vm734_vm2, %v730_v24, %v2249_v15  ;;  %v740_v38 = vsel %vm734_vm2, %v731_v32, %v2250_v22 }
 0x1b7   : > { %1926 = vmatprep.mubr.f32.mxu0 %v739_v28  ;;  %v2263_v30 = vpop.permute.xlu0 %2262 }
 0x1b8   : > { %v2265_v33 = vunpack.i.h.bf16 %v2263_v30  ;;  %v2264_v34 = vunpack.i.l.bf16 %v2263_v30  ;;  %v723_v35 = vsel %vm716_vm0, %v3118_v16, %v2259_v27  ;;  %v724_v36 = vsel %vm716_vm0, %v3121_v18, %v2260_v25  ;;  %2053 = vmatpush3.bf16.msra.mxu1 %v2050_v52 }
 0x1b9   : > { %v2268_v37 = vpop.permute.xlu1 %2267 }
 0x1ba   : > { %v2270_v39 = vunpack.i.h.bf16 %v2268_v37  ;;  %v2269_v40 = vunpack.i.l.bf16 %v2268_v37  ;;  %1927 = vmatmul.mubr.f32.gmra.mrb[4].mxu0 %v740_v38  ;;  %v732_v41 = vsel %vm725_vm1, %v723_v35, %v2264_v34  ;;  %v733_v42 = vsel %vm725_vm1, %v724_v36, %v2265_v33 }
 0x1bb   : > { %v2625_v34 = vmov 0   ;;  %v903_v35 = vsub.s32 1, %v3060_v4  ;;  %v1061_v37 = vsub.s32 2, %v3060_v4 }
 0x1bc   : > { %v741_v43 = vsel %vm734_vm2, %v732_v41, %v2269_v40  ;;  %v742_v46 = vsel %vm734_vm2, %v733_v42, %v2270_v39  ;;  %2271 = vset.pattern.permute.xlu1 %v2625_v34  ;;  %2272 = vset.pattern.permute.xlu0 %v2625_v34  ;;  %v1042_v39 = vstv %s1808_s28 }
 0x1bd   : > { %1929 = vmatprep.mubr.f32.mxu0 %v741_v43  ;;  %v904_v36 = vrot.slane %v3166_v55, %v903_v35  ;;  %v1062_v43 = vrot.slane %v3166_v55, %v1061_v37 }
 0x1be   : > { %1930 = vmatmul.mubr.f32.gmra.mrb[6].mxu0 %v742_v46 }
 0x284   : > { %v1922_v57 = vpop.f32.mrb[0].mxu0 }
 0x285   : > { %v835_v59 = vadd.f32 %v1922_v57, %v762_v56  ;;  %v829_v60 = vpop.f32.mrb[1].mxu0 }
 0x286   : > { %v830_v61 = vadd.f32 %v829_v60, %v762_v56 }
 0x287   : > { %v878_v62 = vmul.f32 %v876_v58, %v835_v59  ;;  %vm869_vm3 = vcmp.gt.f32.partialorder %v835_v59, 0.0 }
 0x288   : > { %vm868_vm4 = vcmp.gt.f32.partialorder %v830_v61, 0.0  ;;  %v877_v63 = vmul.f32 %v876_v58, %v830_v61 }
 0x289   : > { %v1925_v1 = vpop.f32.mrb[2].mxu0  ;;  %v886_v8 = vsel %vm869_vm3, %v835_v59, %v878_v62 }
 0x28a   : > { %v845_v2 = vadd.f32 %v1925_v1, %v762_v56  ;;  %v839_v5 = vpop.f32.mrb[3].mxu0  ;;  %v885_v6 = vsel %vm868_vm4, %v830_v61, %v877_v63 }
 0x28b   : > { %v840_v7 = vadd.f32 %v839_v5, %v762_v56  ;;  %1948 = vmatprep.mubr.msk.f32.mxu1 %vm725_vm1, %v885_v6 }
 0x28c   : > { %v880_v9 = vmul.f32 %v876_v58, %v845_v2  ;;  %1949 = vmatmul.mubr.msk.f32.vlgmr.msra.gmra.mrb[0].mxu1 %vm725_vm1, %v886_v8  ;;  %vm871_vm5 = vcmp.gt.f32.partialorder %v845_v2, 0.0 }
 0x28d   : > { %vm870_vm6 = vcmp.gt.f32.partialorder %v840_v7, 0.0  ;;  %v879_v10 = vmul.f32 %v876_v58, %v840_v7  ;;  %v1928_v11 = vpop.f32.mrb[4].mxu0 }
 0x28e   : > { %v855_v12 = vadd.f32 %v1928_v11, %v762_v56  ;;  %v849_v13 = vpop.f32.mrb[5].mxu0  ;;  %v888_v20 = vsel %vm871_vm5, %v845_v2, %v880_v9 }
 0x28f   : > { %v850_v14 = vadd.f32 %v849_v13, %v762_v56  ;;  %v887_v15 = vsel %vm870_vm6, %v840_v7, %v879_v10  ;;  %vm1151_vm6 = vcmask 1041409  }
 0x290   : > { %v882_v19 = vmul.f32 %v876_v58, %v855_v12  ;;  %1951 = vmatprep.mubr.msk.f32.mxu1 %vm725_vm1, %v887_v15  ;;  %vm873_vm7 = vcmp.gt.f32.partialorder %v855_v12, 0.0 }
 0x291   : > { %vm872_vm8 = vcmp.gt.f32.partialorder %v850_v14, 0.0  ;;  %v881_v21 = vmul.f32 %v876_v58, %v850_v14  ;;  %v1931_v22 = vpop.f32.mrb[6].mxu0  ;;  %1952 = vmatmul.mubr.msk.f32.gmra.mrb[2].mxu1 %vm725_vm1, %v888_v20 }
 0x292   : > { %v865_v23 = vadd.f32 %v1931_v22, %v762_v56  ;;  %v859_v24 = vpop.f32.mrb[7].mxu0  ;;  %v890_v29 = vsel %vm873_vm7, %v855_v12, %v882_v19  ;;  %vm1153_vm7 = vcmask 1042434  }
 0x293   : > { %v860_v25 = vadd.f32 %v859_v24, %v762_v56  ;;  %v889_v27 = vsel %vm872_vm8, %v850_v14, %v881_v21  ;;  %vm1155_vm8 = vcmask 1043459  }
 0x294   : > { %v884_v28 = vmul.f32 %v876_v58, %v865_v23  ;;  %1954 = vmatprep.mubr.msk.f32.mxu1 %vm725_vm1, %v889_v27  ;;  %vm875_vm9 = vcmp.gt.f32.partialorder %v865_v23, 0.0 }
 0x295   : > { %vm874_vm10 = vcmp.gt.f32.partialorder %v860_v25, 0.0  ;;  %v883_v30 = vmul.f32 %v876_v58, %v860_v25  ;;  %1955 = vmatmul.mubr.msk.f32.gmra.mrb[4].mxu1 %vm725_vm1, %v890_v29 }
 0x296   : > { %v892_v33 = vsel %vm875_vm9, %v865_v23, %v884_v28  ;;  %vm1157_vm9 = vcmask 1044484  }
 0x297   : > { %v891_v32 = vsel %vm874_vm10, %v860_v25, %v883_v30  ;;  %vm1159_vm10 = vcmask 1045509  }
 0x298   : > { %1957 = vmatprep.mubr.msk.f32.mxu1 %vm725_vm1, %v891_v32 }
 0x299   : > { %1958 = vmatmul.mubr.msk.f32.gmra.mrb[6].mxu1 %vm725_vm1, %v892_v33 }
 0x35f   : > { %v1950_v38 = vpop.f32.mrb[0].mxu1 }
 0x360   : > { %v1001_v40 = vadd.f32 %v1950_v38, %v904_v36  ;;  %v995_v41 = vpop.f32.mrb[1].mxu1 }
 0x361   : > { %v996_v42 = vadd.f32 %v995_v41, %v904_v36 }
 0x362   : > { %vm1035_vm11 = vcmp.gt.f32.partialorder %v1001_v40, 0.0  ;;  %v1044_v46 = vmul.f32 %v1042_v39, %v1001_v40 }
 0x363   : > { %vm1034_vm12 = vcmp.gt.f32.partialorder %v996_v42, 0.0  ;;  %v1043_v47 = vmul.f32 %v1042_v39, %v996_v42 }
 0x364   : > { %v1953_v48 = vpop.f32.mrb[2].mxu1  ;;  %v1052_v49 = vsel %vm1035_vm11, %v1001_v40, %v1044_v46  ;;  %v1105_v40 = vand.u32 127, %v527_v0  ;;  %vm1161_vm11 = vcmask 1046534  }
 0x365   : > { %v1011_v50 = vadd.f32 %v1953_v48, %v904_v36  ;;  %v1005_v51 = vpop.f32.mrb[3].mxu1  ;;  %v1064_v52 = vmul.f32 %v1062_v43, %v1052_v49  ;;  %v1051_v56 = vsel %vm1034_vm12, %v996_v42, %v1043_v47  ;;  %v1095_v42 = vstv %s516_s25 }
 0x366   : > { %v1006_v57 = vadd.f32 %v1005_v51, %v904_v36  ;;  %v1063_v58 = vmul.f32 %v1062_v43, %v1051_v56  ;;  %v1121_v47 = vsub.s32 %v1105_v40, %v3060_v4  ;;  %vm1163_vm12 = vcmask 1047559  }
 0x367   : > { %vm1037_vm13 = vcmp.gt.f32.partialorder %v1011_v50, 0.0  ;;  %v1046_v59 = vmul.f32 %v1042_v39, %v1011_v50  ;;  %v1074_v60 = vsel %vm716_vm0, %v1064_v52, 0.0 }
 0x368   : > { %vm1036_vm14 = vcmp.gt.f32.partialorder %v1006_v57, 0.0  ;;  %v1045_v61 = vmul.f32 %v1042_v39, %v1006_v57  ;;  %1075 = vadd.xlane.f32.xlu1 %v1074_v60  ;;  %v1956_v62 = vpop.f32.mrb[4].mxu1  ;;  %v1071_v63 = vsel %vm716_vm0, %v1063_v58, 0.0 }
 0x369   : > { %v1021_v1 = vadd.f32 %v1956_v62, %v904_v36  ;;  %v1015_v2 = vpop.f32.mrb[5].mxu1  ;;  %1072 = vadd.xlane.f32.xlu0 %v1071_v63  ;;  %v1054_v5 = vsel %vm1037_vm13, %v1011_v50, %v1046_v59 }
 0x36a   : > { %v1016_v6 = vadd.f32 %v1015_v2, %v904_v36  ;;  %v1066_v7 = vmul.f32 %v1062_v43, %v1054_v5  ;;  %v1053_v8 = vsel %vm1036_vm14, %v1006_v57, %v1045_v61  ;;  %vm1167_vm14 = vcmask 64512  }
 0x36b   : > { %vm1039_vm15 = vcmp.gt.f32.partialorder %v1021_v1, 0.0  ;;  %v1048_v9 = vmul.f32 %v1042_v39, %v1021_v1  ;;  %v1065_v13 = vmul.f32 %v1062_v43, %v1053_v8 }
 0x36c   : > { %vm1038_vm3 = vcmp.gt.f32.partialorder %v1016_v6, 0.0  ;;  %v1047_v10 = vmul.f32 %v1042_v39, %v1016_v6  ;;  %v1959_v11 = vpop.f32.mrb[6].mxu1  ;;  %v1080_v12 = vsel %vm716_vm0, %v1066_v7, 0.0 }
 0x36d   : > { %v1031_v14 = vadd.f32 %v1959_v11, %v904_v36  ;;  %v1025_v15 = vpop.f32.mrb[7].mxu1  ;;  %1081 = vadd.xlane.f32.xlu0 %v1080_v12  ;;  %v1056_v19 = vsel %vm1039_vm15, %v1021_v1, %v1048_v9  ;;  %v1077_v25 = vsel %vm716_vm0, %v1065_v13, 0.0  ;;  %vm2627_vm15 = vmmov 0  }
 0x36e   : > { %v1026_v20 = vadd.f32 %v1025_v15, %v904_v36  ;;  %v1055_v21 = vsel %vm1038_vm3, %v1016_v6, %v1047_v10  ;;  %v1068_v27 = vmul.f32 %v1062_v43, %v1056_v19 }
 0x36f   : > { %vm1041_vm4 = vcmp.gt.f32.partialorder %v1031_v14, 0.0  ;;  %v1050_v22 = vmul.f32 %v1042_v39, %v1031_v14  ;;  %v1067_v23 = vmul.f32 %v1062_v43, %v1055_v21 }
 0x370   : > { %vm1040_vm5 = vcmp.gt.f32.partialorder %v1026_v20, 0.0  ;;  %v1049_v24 = vmul.f32 %v1042_v39, %v1026_v20  ;;  %v1086_v33 = vsel %vm716_vm0, %v1068_v27, 0.0  ;;  %v1106_v39 = vld [vmem:[%s435_s19] sm:$0xff]  ;;  %s2528_s19 = scalar_lea.vmem %s2527_s26, 256 }
 0x371   : > { %1078 = vadd.xlane.f32.xlu0 %v1077_v25  ;;  %v1083_v28 = vsel %vm716_vm0, %v1067_v23, 0.0  ;;  %v1058_v29 = vsel %vm1041_vm4, %v1031_v14, %v1050_v22 }
 0x372   : > { %1084 = vadd.xlane.f32.xlu1 %v1083_v28  ;;  %v1057_v30 = vsel %vm1040_vm5, %v1026_v20, %v1049_v24  ;;  %v1070_v34 = vmul.f32 %v1062_v43, %v1058_v29 }
 0x373   : > { %v1069_v32 = vmul.f32 %v1062_v43, %v1057_v30 }
 0x374   : > { %v1092_v38 = vsel %vm716_vm0, %v1070_v34, 0.0  ;;  %v1207_v34 = vsub.s32 4, %v3060_v4 }
 0x375   : > { %1087 = vadd.xlane.f32.xlu0 %v1086_v33  ;;  %v1089_v36 = vsel %vm716_vm0, %v1069_v32, 0.0  ;;  %v1200_v32 = vsub.s32 3, %v3060_v4 }
 0x376   : > { %1090 = vadd.xlane.f32.xlu1 %v1089_v36 }
 0x379   : > { %1093 = vadd.xlane.f32.xlu0 %v1092_v38  ;;  %v1221_v38 = vsub.s32 6, %v3060_v4 }
 0x387   : > { %1108 = vperm.xlu1 %2271, %v1106_v39   ;;  %v1214_v39 = vsub.s32 5, %v3060_v4 }
 0x3f5   : > { %v1076_v46 = vpop.xlane.xlu1 %1075 }
 0x3f6   : > { %v1073_v41 = vpop.xlane.xlu0 %1072  ;;  %v1097_v48 = vadd.f32 %v1095_v42, %v1076_v46  ;;  %v1398_v46 = vld [vmem:[#allocation12] sm:$0xff] }
 0x3f7   : > { %v1096_v43 = vadd.f32 %v1095_v42, %v1073_v41  ;;  %v1228_v41 = vsub.s32 7, %v3060_v4 }
 0x3f8   : > { %v1126_v50 = vrot.slane %v1097_v48, %v1121_v47  ;;  %v1400_v48 = vld [vmem:[#allocation12 + $0x10] sm:$0xff] }
 0x3f9   : > { %v1122_v51 = vrot.slane %v1096_v43, %v1121_v47  ;;  %v2626_v43 = vmov 0.0|0.0  }
 0x3fa   : > { %v1082_v49 = vpop.xlane.xlu0 %1081  ;;  %2054 = vmatprep.subr.bf16.mxu1 %v2626_v43  ;;  %2072 = vmatprep.subr.bf16.mxu0 %v2626_v43 }
 0x3fb   : > { %v1099_v52 = vadd.f32 %v1095_v42, %v1082_v49  ;;  %v1152_v0 = vsel %vm1151_vm6, %v1126_v50, %v1122_v51  ;;  %v1401_v49 = vld [vmem:[#allocation12 + $0x18] sm:$0xff]  ;;  %v1402_v51 = vld [vmem:[#allocation12 + $0x20] sm:$0xff] }
 0x3fc   : > { %v2058_v50 = vpack.c.bf16 %v1401_v49, %v1400_v48 }
 0x3fd   : > { %v1134_v61 = vrot.slane %v1099_v52, %v1121_v47  ;;  %v1403_v52 = vld [vmem:[#allocation12 + $0x28] sm:$0xff] }
 0x3fe   : > { %v1079_v56 = vpop.xlane.xlu0 %1078 }
 0x3ff   : > { %v1098_v57 = vadd.f32 %v1095_v42, %v1079_v56  ;;  %v1085_v58 = vpop.xlane.xlu1 %1084  ;;  %v2061_v56 = vpack.c.bf16 %v1403_v52, %v1402_v51 }
 0x400   : > { %v1100_v59 = vadd.f32 %v1095_v42, %v1085_v58  ;;  %v1405_v58 = vld [vmem:[#allocation12 + $0x38] sm:$0xff] }
 0x401   : > { %v1130_v60 = vrot.slane %v1098_v57, %v1121_v47  ;;  %v1404_v57 = vld [vmem:[#allocation12 + $0x30] sm:$0xff] }
 0x402   : > { %v1138_v62 = vrot.slane %v1100_v59, %v1121_v47  ;;  %v1088_v63 = vpop.xlane.xlu0 %1087  ;;  %v2064_v59 = vpack.c.bf16 %v1405_v58, %v1404_v57  ;;  %v1322_v57 = vrot.slane %v3057_v3, 1 }
 0x403   : > { %v1154_v1 = vsel %vm1153_vm7, %v1130_v60, %v1152_v0  ;;  %v1101_v2 = vadd.f32 %v1095_v42, %v1088_v63  ;;  %v1091_v5 = vpop.xlane.xlu1 %1090  ;;  %v1406_v60 = vld [vmem:[#allocation12 + $0x40] sm:$0xff]  ;;  %v1407_v0 = vld [vmem:[#allocation12 + $0x48] sm:$0xff]  ;;  %v1409_v63 = vld [vmem:[#allocation12 + $0x58] sm:$0xff] }
 0x404   : > { %v1156_v6 = vsel %vm1155_vm8, %v1134_v61, %v1154_v1  ;;  %v1102_v7 = vadd.f32 %v1095_v42, %v1091_v5  ;;  %v2067_v61 = vpack.c.bf16 %v1407_v0, %v1406_v60  ;;  %v1323_v60 = vrot.slane %v3057_v3, 2 }
 0x405   : > { %v1158_v8 = vsel %vm1157_vm9, %v1138_v62, %v1156_v6  ;;  %v1142_v9 = vrot.slane %v1101_v2, %v1121_v47  ;;  %v1408_v62 = vld [vmem:[#allocation12 + $0x50] sm:$0xff]  ;;  %v1324_v0 = vrot.slane %v3057_v3, 3 }
 0x406   : > { %v1146_v10 = vrot.slane %v1102_v7, %v1121_v47  ;;  %v1094_v11 = vpop.xlane.xlu0 %1093  ;;  %v2070_v1 = vpack.c.bf16 %v1409_v63, %v1408_v62 }
 0x407   : > { %v1103_v12 = vadd.f32 %v1095_v42, %v1094_v11  ;;  %v1109_v13 = vpop.permute.xlu1 %1108  ;;  %v1160_v14 = vsel %vm1159_vm10, %v1142_v9, %v1158_v8 }
 0x408   : > { %vm1110_vm13 = vcmp.lt.s32.totalorder %v1105_v40, %v1109_v13  ;;  %v1162_v19 = vsel %vm1161_vm11, %v1146_v10, %v1160_v14 }
 0x409   : > { %v1150_v15 = vrot.slane %v1103_v12, %v1121_v47  ;;  %v1399_v47 = vld [vmem:[#allocation12 + $0x8] sm:$0xff] }
 0x40b   : > { %v1164_v20 = vsel %vm1163_vm12, %v1150_v15, %v1162_v19 }
 0x40c   : > { %v1166_v21 = vsel %vm1110_vm13, %v1164_v20, -1e+09 }
 0x40d   : > { %v1168_v22 = vsel %vm1167_vm14, %v1166_v21, -inf }
 0x40e   : > { %1169 = vmax.xlane.f32.xlu0 %v1168_v22 }
 0x49b   : > { %v1170_v23 = vpop.xlane.xlu0 %1169 }
 0x49c   : > { %v1171_v24 = vsub.f32 %v1166_v21, %v1170_v23 }
 0x49e   : > { %v1172_v25 = vmul.f32 1.442695, %v1171_v24 }
 0x4a0   : > { %2274 = vpow2.f32 %v1172_v25 }
 0x4aa   : > { %v2275_v27 = vpop.eup %2274 }
 0x4ab   : > { %v1174_v28 = vsel %vm1167_vm14, %v2275_v27, 0.0  ;;  %v1194_v29 = vrot.slane %v2275_v27, %v1061_v37  ;;  %v1180_v30 = vrot.slane %v2275_v27, %v3067_v17  ;;  %v1201_v33 = vrot.slane %v2275_v27, %v1200_v32 }
 0x4ac   : > { %1175 = vadd.xlane.f32.xlu0 %v1174_v28  ;;  %v1208_v36 = vrot.slane %v2275_v27, %v1207_v34  ;;  %v1222_v37 = vrot.slane %v2275_v27, %v1221_v38  ;;  %v1187_v17 = vrot.slane %v2275_v27, %v903_v35  ;;  %v1215_v40 = vrot.slane %v2275_v27, %v1214_v39 }
 0x4ad   : > { %1196 = vbcast.lane.b32.xlu1 %v1194_v29, 256  ;;  %v1229_v42 = vrot.slane %v2275_v27, %v1228_v41  ;;  %v2055_v35 = vpack.c.bf16 %v1399_v47, %v1398_v46 }
 0x4af   : > { %2056 = vmatpush3.bf16.msra.mxu1 %v2055_v35 }
 0x4b0   : > { %2057 = vmatprep.subr.bf16.mxu1 %v2626_v43 }
 0x4b1   : > { %1182 = vbcast.lane.b32.xlu1 %v1180_v30, 256 }
 0x4b3   : > { %2059 = vmatpush3.bf16.msra.mxu1 %v2058_v50 }
 0x4b4   : > { %2060 = vmatprep.subr.bf16.mxu1 %v2626_v43 }
 0x4b5   : > { %1203 = vbcast.lane.b32.xlu1 %v1201_v33, 256 }
 0x4b7   : > { %2062 = vmatpush3.bf16.msra.mxu1 %v2061_v56 }
 0x4b8   : > { %2063 = vmatprep.subr.bf16.mxu1 %v2626_v43 }
 0x4b9   : > { %1210 = vbcast.lane.b32.xlu1 %v1208_v36, 256 }
 0x4bb   : > { %2065 = vmatpush3.bf16.msra.mxu1 %v2064_v59 }
 0x4bc   : > { %2066 = vmatprep.subr.bf16.mxu1 %v2626_v43 }
 0x4bd   : > { %1224 = vbcast.lane.b32.xlu1 %v1222_v37, 256 }
 0x4bf   : > { %2068 = vmatpush3.bf16.msra.mxu1 %v2067_v61 }
 0x4c0   : > { %2069 = vmatprep.subr.bf16.mxu1 %v2626_v43 }
 0x4c1   : > { %1368 = vrot.lane.b32.xlu1 %v3057_v3, %s2622_s27 }
 0x4c2   : > { %1189 = vbcast.lane.b32.xlu0 %v1187_v17, 256 }
 0x4c3   : > { %2071 = vmatpush3.bf16.msra.mxu1 %v2070_v1  ;;  %v1326_v1 = vrot.slane %v3057_v3, 5 }
 0x4c6   : > { %1217 = vbcast.lane.b32.xlu0 %v1215_v40, 256 }
 0x4ca   : > { %1231 = vbcast.lane.b32.xlu0 %v1229_v42, 256 }
 0x51f   : > { %v1197_v2 = vpop.permute.xlu1 %1196 }
 0x520   : > { %v1235_v7 = vmul.f32 %v1197_v2, %v3096_v53  ;;  %v1327_v2 = vrot.slane %v3057_v3, 6 }
 0x522   : > { %v1255_v12 = vsel %vm716_vm0, %v1235_v7, 0.0 }
 0x523   : > { %v1183_v5 = vpop.permute.xlu1 %1182  ;;  %v1256_v20 = vrot.slane %v1255_v12, 4 }
 0x524   : > { %v1233_v8 = vmul.f32 %v1183_v5, %v3072_v26 }
 0x525   : > { %v1257_v23 = vadd.f32 %v1256_v20, %v1255_v12 }
 0x526   : > { %v1241_v13 = vsel %vm716_vm0, %v1233_v8, 0.0 }
 0x527   : > { %v1204_v6 = vpop.permute.xlu1 %1203  ;;  %v1242_v53 = vrot.slane %v1241_v13, 4  ;;  %v1258_v28 = vrot.slane %v1257_v23, 2 }
 0x528   : > { %v1236_v9 = vmul.f32 %v1204_v6, %v3099_v54 }
 0x529   : > { %v1243_v24 = vadd.f32 %v1242_v53, %v1241_v13  ;;  %v1259_v37 = vadd.f32 %v1258_v28, %v1257_v23 }
 0x52a   : > { %v1262_v14 = vsel %vm716_vm0, %v1236_v9, 0.0 }
 0x52b   : > { %v1211_v10 = vpop.permute.xlu1 %1210  ;;  %v1263_v22 = vrot.slane %v1262_v14, 4  ;;  %v1244_v29 = vrot.slane %v1243_v24, 2  ;;  %v1260_v47 = vrot.slane %v1259_v37, 1 }
 0x52c   : > { %v1237_v11 = vmul.f32 %v1211_v10, %v3087_v44 }
 0x52d   : > { %v1264_v44 = vadd.f32 %v1263_v22, %v1262_v14  ;;  %v1245_v17 = vadd.f32 %v1244_v29, %v1243_v24  ;;  %v1261_v62 = vadd.f32 %v1260_v47, %v1259_v37 }
 0x52e   : > { %v1269_v15 = vsel %vm716_vm0, %v1237_v11, 0.0 }
 0x52f   : > { %v1225_v19 = vpop.permute.xlu1 %1224  ;;  %v1270_v26 = vrot.slane %v1269_v15, 4  ;;  %v1265_v30 = vrot.slane %v1264_v44, 2  ;;  %v1246_v35 = vrot.slane %v1245_v17, 1 }
 0x530   : > { %v1239_v21 = vmul.f32 %v1225_v19, %v3118_v16 }
 0x531   : > { %v1271_v27 = vadd.f32 %v1270_v26, %v1269_v15  ;;  %v1266_v16 = vadd.f32 %v1265_v30, %v1264_v44  ;;  %v1247_v5 = vadd.f32 %v1246_v35, %v1245_v17 }
 0x532   : > { %v1283_v54 = vsel %vm716_vm0, %v1239_v21, 0.0 }
 0x533   : > { %v1284_v25 = vrot.slane %v1283_v54, 4  ;;  %v1272_v38 = vrot.slane %v1271_v27, 2  ;;  %v1267_v49 = vrot.slane %v1266_v16, 1 }
 0x535   : > { %v1285_v33 = vadd.f32 %v1284_v25, %v1283_v54  ;;  %v1273_v42 = vadd.f32 %v1272_v38, %v1271_v27  ;;  %v1268_v6 = vadd.f32 %v1267_v49, %v1266_v16  ;;  %v2278_v27 = vld [vmem:[%s426_s13] sm:$0xff]  ;;  %s2522_s13 = scalar_lea.vmem %s3305_s20, 128 }
 0x536   : > { %v1328_v28 = vrot.slane %v2278_v27, 7  ;;  %p2523_p0 = scmp.ne.s32.totalorder %s3305_s20, %s2522_s13  ;;  %p2530_p1 = scmp.lt.s32.totalorder %s2528_s19, %s2522_s13 }
 0x537   : > { %v1286_v40 = vrot.slane %v1285_v33, 2  ;;  %v1274_v56 = vrot.slane %v1273_v42, 1 }
 0x538   : > { %p2524_p6 = pnand %p2523_p0, %p3429_p7  ;;  %p2531_p4 = por %p2530_p1, %p2529_p9 }
 0x539   : > { %v1176_v36 = vpop.xlane.xlu0 %1175  ;;  %v1287_v50 = vadd.f32 %v1286_v40, %v1285_v33  ;;  %v1275_v9 = vadd.f32 %v1274_v56, %v1273_v42 }
 0x53a   : > { %2276 = vrcp.f32 %v1176_v36  ;;  %p2525_p11 = pneg %p2524_p6 }
 0x53b   : > { %v1288_v7 = vrot.slane %v1287_v50, 1 }
 0x53c   : > { %p2532_p8 = pnand %p2531_p4, %p2525_p11 }
 0x53d   : > { %v1190_v41 = vpop.permute.xlu0 %1189  ;;  %v1289_v26 = vadd.f32 %v1288_v7, %v1287_v50  ;;  %v2628_v7 = vmov 0.0  }
 0x53e   : > { %v1234_v46 = vmul.f32 %v1190_v41, %v3076_v31  ;;  %v1325_v31 = vrot.slane %v3057_v3, 4  ;;  %1984 = vmatprep.mubr.msk.f32.mxu1 %vm2627_vm15, %v2628_v7  ;;  %2003 = vmatprep.mubr.msk.f32.mxu0 %vm2627_vm15, %v2628_v7 }
 0x540   : > { %v1248_v48 = vsel %vm716_vm0, %v1234_v46, 0.0 }
 0x541   : > { %v1249_v51 = vrot.slane %v1248_v48, 4  ;;  %v1218_v52 = vpop.permute.xlu0 %1217 }
 0x542   : > { %v1238_v58 = vmul.f32 %v1218_v52, %v3090_v45 }
 0x543   : > { %v1250_v59 = vadd.f32 %v1249_v51, %v1248_v48 }
 0x544   : > { %v3247_v61 = vpop.eup %2276  ;;  %v1276_v63 = vsel %vm716_vm0, %v1238_v58, 0.0 }
 0x545   : > { %v1251_v45 = vrot.slane %v1250_v59, 2  ;;  %v1232_v8 = vpop.permute.xlu0 %1231  ;;  %v1277_v10 = vrot.slane %v1276_v63, 4  ;;  %v1300_v12 = vrot.slane %v3247_v61, 2  ;;  %v1301_v14 = vrot.slane %v3247_v61, 3 }
 0x546   : > { %v1240_v11 = vmul.f32 %v1232_v8, %v3121_v18  ;;  %v1302_v15 = vrot.slane %v3247_v61, 4  ;;  %v1304_v19 = vrot.slane %v3247_v61, 6  ;;  %v1314_v20 = vmul.f32 %v3247_v61, %v1247_v5  ;;  %v1493_v5 = vld [vmem:[#allocation14 + $0x10] sm:$0xff]  ;;  %v1494_v8 = vld [vmem:[#allocation14 + $0x18] sm:$0xff] }
 0x547   : > { %v1252_v13 = vadd.f32 %v1251_v45, %v1250_v59  ;;  %v1278_v21 = vadd.f32 %v1277_v10, %v1276_v63  ;;  %v1316_v22 = vmul.f32 %v1300_v12, %v1261_v62  ;;  %v1317_v18 = vmul.f32 %v1301_v14, %v1268_v6  ;;  %v1491_v62 = vld [vmem:[#allocation14] sm:$0xff]  ;;  %v1492_v63 = vld [vmem:[#allocation14 + $0x8] sm:$0xff] }
 0x548   : > { %v1290_v53 = vsel %vm716_vm0, %v1240_v11, 0.0  ;;  %v1299_v24 = vrot.slane %v3247_v61, 1  ;;  %v1318_v25 = vmul.f32 %v1302_v15, %v1275_v9  ;;  %v1303_v30 = vrot.slane %v3247_v61, 5 }
 0x549   : > { %v1253_v54 = vrot.slane %v1252_v13, 1  ;;  %v1291_v23 = vrot.slane %v1290_v53, 4  ;;  %v1279_v44 = vrot.slane %v1278_v21, 2  ;;  %v1320_v36 = vmul.f32 %v1304_v19, %v1289_v26 }
 0x54a   : > { %v1305_v37 = vrot.slane %v3247_v61, 7  ;;  %v1337_v17 = vmul.f32 %v2278_v27, %v1314_v20  ;;  %v1339_v16 = vmul.f32 %v1323_v60, %v1316_v22  ;;  %v1355_v42 = vrot.slane %v1316_v22, 6 }
 0x54b   : > { %v1254_v29 = vadd.f32 %v1253_v54, %v1252_v13  ;;  %v1292_v33 = vadd.f32 %v1291_v23, %v1290_v53  ;;  %v1280_v38 = vadd.f32 %v1279_v44, %v1278_v21  ;;  %v1357_v46 = vrot.slane %v1317_v18, 5  ;;  %v1496_v21 = vld [vmem:[#allocation14 + $0x28] sm:$0xff] }
 0x54c   : > { %v1359_v48 = vrot.slane %v1318_v25, 4  ;;  %v1340_v35 = vmul.f32 %v1324_v0, %v1317_v18  ;;  %v1341_v49 = vmul.f32 %v1325_v31, %v1318_v25  ;;  %v1343_v56 = vmul.f32 %v1327_v2, %v1320_v36 }
 0x54d   : > { %v1315_v40 = vmul.f32 %v1299_v24, %v1254_v29  ;;  %v1293_v41 = vrot.slane %v1292_v33, 2  ;;  %v1281_v47 = vrot.slane %v1280_v38, 1  ;;  %v1381_v59 = vrot.slane %v1339_v16, 6  ;;  %v1497_v16 = vld [vmem:[#allocation14 + $0x30] sm:$0xff] }
 0x54e   : > { %v2073_v45 = vpack.c.bf16 %v1492_v63, %v1491_v62  ;;  %v1383_v31 = vrot.slane %v1340_v35, 5  ;;  %v1385_v2 = vrot.slane %v1341_v49, 4  ;;  %v2076_v12 = vpack.c.bf16 %v1494_v8, %v1493_v5 }
 0x54f   : > { %v1338_v50 = vmul.f32 %v1322_v57, %v1315_v40  ;;  %v1353_v51 = vrot.slane %v1315_v40, 7  ;;  %v1294_v52 = vadd.f32 %v1293_v41, %v1292_v33  ;;  %v1282_v58 = vadd.f32 %v1281_v47, %v1280_v38  ;;  %v1498_v40 = vld [vmem:[#allocation14 + $0x38] sm:$0xff] }
 0x550   : > { %2074 = vmatpush3.bf16.msra.mxu0 %v2073_v45  ;;  %v1363_v22 = vrot.slane %v1320_v36, 2  ;;  %v1389_v27 = vrot.slane %v1343_v56, 2  ;;  %v2082_v41 = vpack.c.bf16 %v1498_v40, %v1497_v16  ;;  %v1488_v47 = vstv %s1809_s18 }
 0x551   : > { %v1354_v61 = vsel %vm1151_vm6, %v1353_v51, %v1314_v20  ;;  %v1379_v60 = vrot.slane %v1338_v50, 7  ;;  %v1295_v6 = vrot.slane %v1294_v52, 1  ;;  %v1319_v0 = vmul.f32 %v1303_v30, %v1282_v58  ;;  %2075 = vmatprep.subr.bf16.mxu0 %v2626_v43  ;;  %v1495_v20 = vld [vmem:[#allocation14 + $0x20] sm:$0xff] }
 0x552   : > { %v1356_v57 = vsel %vm1153_vm7, %v1355_v42, %v1354_v61  ;;  %v1413_v42 = vrot.slane %v3166_v55, %v1200_v32  ;;  %v1502_v50 = vrot.slane %v3166_v55, %v1207_v34  ;;  %v1583_v58 = vrot.slane %v3166_v55, %v1214_v39 }
 0x553   : > { %v1296_v9 = vadd.f32 %v1295_v6, %v1294_v52  ;;  %v1358_v10 = vsel %vm1155_vm8, %v1357_v46, %v1356_v57  ;;  %v1380_v11 = vsel %vm1151_vm6, %v1379_v60, %v1337_v17  ;;  %v1361_v13 = vrot.slane %v1319_v0, 3 }
 0x554   : > { %v1360_v14 = vsel %vm1157_vm9, %v1359_v48, %v1358_v10  ;;  %v1342_v15 = vmul.f32 %v1326_v1, %v1319_v0  ;;  %v1382_v19 = vsel %vm1153_vm7, %v1381_v59, %v1380_v11  ;;  %2077 = vmatpush3.bf16.msra.mxu0 %v2076_v12  ;;  %v2079_v1 = vpack.c.bf16 %v1496_v21, %v1495_v20 }
 0x555   : > { %v1321_v53 = vmul.f32 %v1305_v37, %v1296_v9  ;;  %v1384_v26 = vsel %vm1155_vm8, %v1383_v31, %v1382_v19  ;;  %v1362_v54 = vsel %vm1159_vm10, %v1361_v13, %v1360_v14  ;;  %2078 = vmatprep.subr.bf16.mxu0 %v2626_v43  ;;  %v1577_v52 = vstv %s1810_s9 }
 0x556   : > { %v1386_v23 = vsel %vm1157_vm9, %v1385_v2, %v1384_v26  ;;  %v1387_v18 = vrot.slane %v1342_v15, 3  ;;  %v1364_v24 = vsel %vm1161_vm11, %v1363_v22, %v1362_v54  ;;  %v1588_v61 = vstv %s1806_s30 }
 0x557   : > { %v1365_v44 = vrot.slane %v1321_v53, 1  ;;  %v1344_v3 = vmul.f32 %v1328_v28, %v1321_v53  ;;  %v1369_v28 = vpop.permute.xlu1 %1368 }
 0x558   : > { %v1388_v25 = vsel %vm1159_vm10, %v1387_v18, %v1386_v23  ;;  %2080 = vmatpush3.bf16.msra.mxu0 %v2079_v1 }
 0x559   : > { %v1366_v29 = vsel %vm1163_vm12, %v1365_v44, %v1364_v24  ;;  %v1391_v30 = vrot.slane %v1344_v3, 1  ;;  %v1390_v33 = vsel %vm1161_vm11, %v1389_v27, %v1388_v25  ;;  %2081 = vmatprep.subr.bf16.mxu0 %v2626_v43 }
 0x55a   : > { %v1396_v38 = vsel %vm716_vm0, %v1366_v29, %v1369_v28 }
 0x55b   : > { %v1392_v36 = vsel %vm1163_vm12, %v1391_v30, %v1390_v33 }
 0x55c   : > { %1393 = vrot.lane.b32.xlu0 %v1392_v36, %s2624_s14  ;;  %2083 = vmatpush3.bf16.msra.mxu0 %v2082_v41 }
 0x5ce   : > { %v1394_v37 = vpop.permute.xlu0 %1393 }
 0x5cf   : > { %v1397_v17 = vsel %vm725_vm1, %v1396_v38, %v1394_v37 }
 0x5d0   : > { %1985 = vmatmul.mubr.msk.f32.vlgmr.msra.gmra.mrb[8].mxu1 %vm734_vm2, %v1397_v17 }
 0x6a3   : > { %v1483_v46 = vpop.f32.mrb[8].mxu1 }
 0x6a4   : > { %v1484_v43 = vadd.f32 %v1483_v46, %v1413_v42  ;;  %v1986_v48 = vpop.f32.mrb[9].mxu1 }
 0x6a6   : > { %vm1487_vm3 = vcmp.gt.f32.partialorder %v1484_v43, 0.0  ;;  %v1489_v35 = vmul.f32 %v1488_v47, %v1484_v43 }
 0x6a8   : > { %v1490_v49 = vsel %vm1487_vm3, %v1484_v43, %v1489_v35 }
 0x6a9   : > { %2004 = vmatmul.mubr.msk.f32.vlgmr.msra.gmra.mrb[8].mxu0 %vm725_vm1, %v1490_v49  ;;  %vm1590_vm1 = vcmask 7168  }
 0x77c   : > { %v1572_v51 = vpop.f32.mrb[8].mxu0 }
 0x77d   : > { %v1573_v56 = vadd.f32 %v1572_v51, %v1502_v50  ;;  %v2005_v32 = vpop.f32.mrb[9].mxu0 }
 0x77f   : > { %vm1576_vm2 = vcmp.gt.f32.partialorder %v1573_v56, 0.0  ;;  %v1578_v59 = vmul.f32 %v1577_v52, %v1573_v56 }
 0x781   : > { %v1579_v62 = vsel %vm1576_vm2, %v1573_v56, %v1578_v59 }
 0x782   : > { %v1584_v63 = vmul.f32 %v1583_v58, %v1579_v62 }
 0x784   : > { %v1585_v5 = vsel %vm716_vm0, %v1584_v63, 0.0 }
 0x785   : > { %1586 = vadd.xlane.f32.xlu1 %v1585_v5 }
 0x812   : > { %v1587_v34 = vpop.xlane.xlu1 %1586 }
 0x813   : > { %v1589_v60 = vadd.f32 %v1588_v61, %v1587_v34 }
 0x815   : > { %1591 = vst.msk [vmem:[%s504_s24] sm:$0xff] %vm1590_vm1, %v1589_v60 }
 0x816   : > { %2535 = shalt.err (!%p2532_p8)
}
 0x817   : > { %s2536_s21 = scalar_lea.hbm %s3303_s16, 128  ;;  %s2540_s14 = scalar_lea.hbm %s3428_s23, 256 }
 0x818   : > { %p2537_p5 = scmp.ne.s32.totalorder %s3303_s16, %s2536_s21  ;;  %p2541_p3 = scmp.lt.u32.totalorder %s3303_s16, %s3428_s23 }
 0x819   : > { %p2542_p2 = scmp.lt.u32.totalorder %s2540_s14, %s2536_s21  ;;  %p2544_p0 = scmp.lt.u32.totalorder %s2536_s21, %s3303_s16 }
 0x81a   : > { %p2538_p13 = pnand %p2537_p5, %p3429_p7 }
 0x81b   : > { %p2543_p12 = por %p2542_p2, %p2541_p3 }
 0x81c   : > { %p2539_p10 = pneg %p2538_p13 }
 0x81d   : > { %p2545_p6 = por %p2544_p0, %p2543_p12 }
 0x81f   : > { %p2546_p11 = pnand %p2545_p6, %p2539_p10 }
 0x821   : > { %2549 = shalt.err (!%p2546_p11)
}
 0x822   : > { %2114 = dma.vmem_to_hbm [thread:$0]  (%p3429_p7), %s3305_s20, 128, %s3303_s16, %s1593_s3  }
 0x823 PF: > { %s3430_s25 = sld [smem:[#allocation26_spill]]  ;;  %s3431_s18 = sld [smem:[#allocation32_spill]] }
 0x824   : > { %p3433_p1 = scmp.ge.s32.totalorder %s2608_s12, 2 }
 0x829   : > { %s1618_s9 = sand.u32 1, %s3430_s25   ;;  %p3432_p9 = scmp.ne.s32.totalorder %s3431_s18, 0 }
 0x82a   : > { %s1619_s30 = scalar_lea.sflag [#allocation4], %s1618_s9 }
 0x82b   : > { %p2146_p4 = pnand %p3433_p1, %p3432_p9 }
 0x82d   : > { %2591 = dma.done.wait (!%p2146_p4), %s1619_s30, 128  }
 0x82e   : > { %2593 = vsyncadd (!%p2146_p4), %s1619_s30, 4294967168  ;;  %s3434_s12 = sld [smem:[#allocation29_spill]]  ;;  %s3435_s15 = sld [smem:[#allocation27_spill]] }
 0x82f   : > { %s3436_s11 = sld [smem:[#allocation30_spill]]  ;;  %s3437_s30 = smov %s2600_s10 }
 0x834   : > { %p29_p8 = scmp.ge.s32.totalorder %s3434_s12, 4   ;;  %s3438_s10 = smov %s3435_s15 }
 0x836   :  { %31 = sbr.rel (!%p29_p8) target bundleno = 16 (0x10), region = 150 }
 0x83d   :  { %1624 = vsyncpa [#allocation3], 1 }
 0x83e   :  { %1626 = vsyncpa [#allocation3 + $0x1], 1 }
 0x83f   :  { %1627 = vsyncpa [#allocation7], 1 }
 0x840   :  { %1629 = vsyncpa [#allocation7 + $0x1], 1 }
 0x841   :  { %1630 = vsyncpa [#allocation10], 1 }
 0x842   :  { %1631 = vsyncpa [#allocation13], 1 }
 0x843   :  { %1632 = vsyncpa [#allocation16], 1 }
 0x844   :  { %1633 = vsyncpa [#allocation4], 1 }
 0x845   :  { %1635 = vsyncpa [#allocation4 + $0x1], 1 }
 0x846   :  { %1636 = vsyncpa [#allocation5], 1 }
 0x847   :  { %1638 = vsyncpa [#allocation5 + $0x1], 1 }

</bundles_post_ra>
